<compile_context>
chip_gen: v5e
topology: v5e:2x2
jax: 0.10.0
libtpu: 0.0.40
codegen_flags: <defaults>
</compile_context>

<pallas_src>
import functools

import jax
import jax.numpy as jnp
from jax import lax
from jax.experimental import pallas as pl
from jax.experimental.pallas import tpu as pltpu

# ---- model hyper-parameters (small, consistent with the module) -------------
DIM = 32            # input_dim
HEADS = 8           # rearrange hard-codes h=8
HEAD_DIM = DIM // HEADS
MLP_DIM = 64
DEPTH = 2
SEQ = 8
BATCH = 2
LN_EPS = 1e-5       # torch.nn.LayerNorm default
SCALE = DIM ** 0.5  # self.scale = input_dim ** 0.5
NEG_INF = -1e30

# ---- packed weight-slab layout (per layer), lane width 128 -------------------
SLAB_LANES = 128
R_WQKV = 0                    # (DIM, 3*DIM)
R_WO = R_WQKV + DIM           # (DIM, DIM)
R_W1 = R_WO + DIM             # (DIM, MLP_DIM)
R_W2 = R_W1 + DIM             # (MLP_DIM, DIM)
R_VEC = R_W2 + MLP_DIM        # 8 vector rows (ln/bias), one per row
V_LN1G, V_LN1B, V_BQKV, V_BO, V_LN2G, V_LN2B, V_B1, V_B2 = range(8)
LAYER_ROWS = R_VEC + 8        # 168 rows per layer (all offsets multiple of 8)


# ---------------- small helpers ------------------------------------------------
def _layernorm(x, g, b):
    mu = jnp.mean(x, axis=-1, keepdims=True)
    var = jnp.mean((x - mu) ** 2, axis=-1, keepdims=True)
    return (x - mu) * lax.rsqrt(var + LN_EPS) * g + b


def _tile_rows(a, reps):
    """(r, c) -> (reps*r, c): out[i*r + m, :] = a[m, :] (layout-trivial reshape)."""
    r, c = a.shape
    return jnp.broadcast_to(a[None, :, :], (reps, r, c)).reshape(reps * r, c)


def _group_div(i, d):
    """Elementwise i // d for non-negative int32 arrays (shift for pow2 d)."""
    if d & (d - 1) == 0:
        return jnp.right_shift(i, d.bit_length() - 1)
    return i // d   # TODO(synk): non-power-of-two group sizes rely on vector int div


def _group_mod(i, d):
    if d & (d - 1) == 0:
        return jnp.bitwise_and(i, d - 1)
    return i - _group_div(i, d) * d


# ---------------- fused encoder kernel ----------------------------------------
def encoder_kernel(x_ref, w_ref, o_ref, *, seq_len, n_layers):
    rows = x_ref.shape[0]        # rows in this block (whole sequences)
    width = HEADS * rows         # lane-dense packed score width

    x = x_ref[...]               # (rows, DIM) f32

    # Constant selector / mask tiles, built in-register (no HBM DMA).
    # sel[h*rows + m, h'*HEAD_DIM + d] = 1.0 iff h == h'
    row_i = lax.broadcasted_iota(jnp.int32, (width, DIM), 0)
    col_i = lax.broadcasted_iota(jnp.int32, (width, DIM), 1)
    sel = (_group_div(row_i, rows) == _group_div(col_i, HEAD_DIM)).astype(jnp.float32)

    # mask_add[n, h*rows + m] = 0 if rows n and m belong to the same sequence else -1e30
    q_i = lax.broadcasted_iota(jnp.int32, (rows, width), 0)
    k_i = _group_mod(lax.broadcasted_iota(jnp.int32, (rows, width), 1), rows)
    mask_add = jnp.where(_group_div(q_i, seq_len) == _group_div(k_i, seq_len),
                         0.0, NEG_INF).astype(jnp.float32)

    for layer in range(n_layers):   # DEPTH=2 -> static unroll (fori_loop if it grows)
        base = layer * LAYER_ROWS
        wqkv = w_ref[base + R_WQKV: base + R_WQKV + DIM, 0:3 * DIM]
        wo = w_ref[base + R_WO: base + R_WO + DIM, 0:DIM]
        w1 = w_ref[base + R_W1: base + R_W1 + DIM, 0:MLP_DIM]
        w2 = w_ref[base + R_W2: base + R_W2 + MLP_DIM, 0:DIM]
        vec = w_ref[base + R_VEC: base + R_VEC + 8, :]          # (8, 128)
        ln1_g = vec[V_LN1G:V_LN1G + 1, 0:DIM]
        ln1_b = vec[V_LN1B:V_LN1B + 1, 0:DIM]
        bqkv = vec[V_BQKV:V_BQKV + 1, 0:3 * DIM]
        bo = vec[V_BO:V_BO + 1, 0:DIM]
        ln2_g = vec[V_LN2G:V_LN2G + 1, 0:DIM]
        ln2_b = vec[V_LN2B:V_LN2B + 1, 0:DIM]
        b1 = vec[V_B1:V_B1 + 1, 0:MLP_DIM]
        b2 = vec[V_B2:V_B2 + 1, 0:DIM]

        # ---- attention sub-block: x = x + fc1(MHA(LN(x))) --------------------
        xn = _layernorm(x, ln1_g, ln1_b)
        # qkv columns are torch's (w, h, d) order; 1/sqrt(D) scale already folded in.
        qkv = jnp.dot(xn, wqkv, preferred_element_type=jnp.float32) + bqkv   # (rows, 3D)
        q = qkv[:, 0:DIM]
        k = qkv[:, DIM:2 * DIM]
        v = qkv[:, 2 * DIM:3 * DIM]

        # packed-head block-diagonal attention (two full-width matmuls, no per-head slicing)
        kb = _tile_rows(k, HEADS) * sel       # (width, DIM)
        vb = _tile_rows(v, HEADS) * sel       # (width, DIM)
        s = lax.dot_general(q, kb, (((1,), (1,)), ((), ())),
                            preferred_element_type=jnp.float32) + mask_add   # (rows, width)
        # NOTE: deliberate numerics decision -- no max subtraction: inputs are
        # layer-normed and carry the folded 1/D score scale, so exp cannot overflow.
        p = jnp.exp(s)                                           # masked entries -> 0
        ctx = jnp.dot(p, vb, preferred_element_type=jnp.float32)   # (rows, DIM), '(h d)' order
        den = jnp.dot(p, sel, preferred_element_type=jnp.float32)  # per-head softmax denom,
        #                                                            broadcast to each head's d lanes
        ctx = ctx * pl.reciprocal(den, approx=True)              # normalize after PV matmul
        x = x + jnp.dot(ctx, wo, preferred_element_type=jnp.float32) + bo    # dropout = identity

        # ---- MLP sub-block: x = x + W2 GELU(W1 LN(x) + b1) + b2 --------------
        xn = _layernorm(x, ln2_g, ln2_b)
        # TODO(synk): torch nn.GELU default is exact erf; tanh approximation used here.
        hid = jax.nn.gelu(jnp.dot(xn, w1, preferred_element_type=jnp.float32) + b1,
                          approximate=True)
        x = x + jnp.dot(hid, w2, preferred_element_type=jnp.float32) + b2
        # dropout = identity

    o_ref[...] = x


# ---------------- parameter packing (wrapper side) -----------------------------
def _pad_block(a, rows):
    a = jnp.asarray(a, jnp.float32)
    return jnp.pad(a, ((0, rows - a.shape[0]), (0, SLAB_LANES - a.shape[1])))


def pack_params(layers):
    """Concatenate all layer params into one (len(layers)*168, 128) f32 slab."""
    inv = jnp.float32(1.0 / SCALE)   # fold the reference's 1/sqrt(D) scaling of q, k and v
    slabs = []
    for lp in layers:
        a, m = lp["attn"], lp["mlp"]
        vec = jnp.concatenate([
            _pad_block(a["ln_g"], 1), _pad_block(a["ln_b"], 1),
            _pad_block(a["bqkv"] * inv, 1), _pad_block(a["bo"], 1),
            _pad_block(m["ln_g"], 1), _pad_block(m["ln_b"], 1),
            _pad_block(m["b1"], 1), _pad_block(m["b2"], 1)], axis=0)        # (8, 128)
        slabs.append(jnp.concatenate([
            _pad_block(a["wqkv"] * inv, DIM),     # rows [0, 32)
            _pad_block(a["wo"], DIM),             # rows [32, 64)
            _pad_block(m["w1"], DIM),             # rows [64, 96)
            _pad_block(m["w2"], MLP_DIM),         # rows [96, 160)
            vec], axis=0))                        # rows [160, 168)
    return jnp.concatenate(slabs, axis=0)


# ---------------- wrapper ------------------------------------------------------
def transformer_encoder(x, layers, mask=None):
    # TODO(synk): masked attention path (F.pad + masked_fill) not implemented;
    # only mask=None is supported, matching the default call.
    assert mask is None
    B, N, D = x.shape
    assert D == DIM

    w_slab = pack_params(layers)
    n_layers = len(layers)

    # Row tiling: whole sequences per block (so the batch mask stays block-local);
    # keep the packed score width HEADS*rows <= 256 lanes.
    spb = 1
    for cand in range(1, B + 1):
        if B % cand == 0 and cand * N * HEADS <= 256:
            spb = cand
    block_rows = spb * N
    if block_rows % 8 != 0:          # fall back to a single full block
        spb, block_rows = B, B * N
    grid = (B // spb,)

    kernel = functools.partial(encoder_kernel, seq_len=N, n_layers=n_layers)
    out = pl.pallas_call(
        kernel,
        out_shape=jax.ShapeDtypeStruct((B * N, D), jnp.float32),
        grid=grid,
        in_specs=[
            pl.BlockSpec((block_rows, D), lambda i: (i, 0)),       # activation row block
            pl.BlockSpec(w_slab.shape, lambda i: (0, 0)),          # weight slab, resident
        ],
        out_specs=pl.BlockSpec((block_rows, D), lambda i: (i, 0)),
        compiler_params=pltpu.CompilerParams(
            dimension_semantics=("parallel",)),                    # shard row blocks (v7x: 2 TCs)
    )(x.reshape(B * N, D).astype(jnp.float32), w_slab)
    return out.reshape(B, N, D).astype(x.dtype)


# ---------------- deterministic parameter init --------------------------------
def init_params(key):
    layers = []
    for _ in range(DEPTH):
        key, *ks = jax.random.split(key, 7)
        # Attention: xavier_uniform_ weights, bias filled with 0.01
        b_qkv = (6.0 / (DIM + 3 * DIM)) ** 0.5
        wqkv = jax.random.uniform(ks[0], (DIM, 3 * DIM), jnp.float32, -b_qkv, b_qkv)
        bqkv = jnp.full((1, 3 * DIM), 0.01, jnp.float32)
        b_o = (6.0 / (DIM + DIM)) ** 0.5
        wo = jax.random.uniform(ks[1], (DIM, DIM), jnp.float32, -b_o, b_o)
        bo = jnp.full((1, DIM), 0.01, jnp.float32)
        # MLP: torch default Linear init (uniform, bound = 1/sqrt(fan_in))
        b1b = 1.0 / DIM ** 0.5
        w1 = jax.random.uniform(ks[2], (DIM, MLP_DIM), jnp.float32, -b1b, b1b)
        b1 = jax.random.uniform(ks[3], (1, MLP_DIM), jnp.float32, -b1b, b1b)
        b2b = 1.0 / MLP_DIM ** 0.5
        w2 = jax.random.uniform(ks[4], (MLP_DIM, DIM), jnp.float32, -b2b, b2b)
        b2 = jax.random.uniform(ks[5], (1, DIM), jnp.float32, -b2b, b2b)
        layers.append({
            "attn": {"ln_g": jnp.ones((1, DIM), jnp.float32),
                     "ln_b": jnp.zeros((1, DIM), jnp.float32),
                     "wqkv": wqkv, "bqkv": bqkv, "wo": wo, "bo": bo},
            "mlp": {"ln_g": jnp.ones((1, DIM), jnp.float32),
                    "ln_b": jnp.zeros((1, DIM), jnp.float32),
                    "w1": w1, "b1": b1, "w2": w2, "b2": b2},
        })
    return layers


if __name__ == "__main__":
    key = jax.random.PRNGKey(0)
    k_x, k_p = jax.random.split(key)
    x = jax.random.normal(k_x, (BATCH, SEQ, DIM), dtype=jnp.float32)
    layers = init_params(k_p)

    out = transformer_encoder(x, layers)
    out = jax.block_until_ready(out)
    assert out.shape == (BATCH, SEQ, DIM)
    assert bool(jnp.all(jnp.isfinite(out)))
    print("KERNEL_OK")
</pallas_src>

<mosaic_0001>
module attributes {stable_mosaic.version = 11 : i64} {
  func.func @encoder_kernel(%arg0: i32, %arg1: memref<16x32xf32, #tpu.memory_space<vmem>>, %arg2: memref<336x128xf32, #tpu.memory_space<vmem>>, %arg3: memref<16x32xf32, #tpu.memory_space<vmem>>) attributes {dimension_semantics = [#tpu.dimension_semantics<parallel>], iteration_bounds = array<i64: 1>, scalar_prefetch = 0 : i64, scratch_operands = 0 : i64, tpu.core_type = #tpu.core_type<tc>, window_params = [{transform_indices = @transform_0, window_bounds = array<i64: 16, 32>}, {pipeline_mode = #tpu.pipeline_mode<synchronous>, transform_indices = @transform_1, window_bounds = array<i64: 336, 128>}, {transform_indices = @transform_2, window_bounds = array<i64: 16, 32>}]} {
    %c0 = arith.constant 0 : index
    %c0_0 = arith.constant 0 : index
    %0 = vector.load %arg1[%c0, %c0_0] : memref<16x32xf32, #tpu.memory_space<vmem>>, vector<16x32xf32>
    %1 = tpu.iota {dimensions = array<i32: 0>} : vector<128x32xi32>
    %2 = tpu.iota {dimensions = array<i32: 1>} : vector<128x32xi32>
    %c4_i32 = arith.constant 4 : i32
    %3 = vector.broadcast %c4_i32 : i32 to vector<128x32xi32>
    %4 = arith.shrsi %1, %3 : vector<128x32xi32>
    %c2_i32 = arith.constant 2 : i32
    %5 = vector.broadcast %c2_i32 : i32 to vector<128x32xi32>
    %6 = arith.shrsi %2, %5 : vector<128x32xi32>
    %7 = arith.cmpi eq, %4, %6 : vector<128x32xi32>
    %8 = arith.extui %7 : vector<128x32xi1> to vector<128x32xi32>
    %9 = arith.sitofp %8 : vector<128x32xi32> to vector<128x32xf32>
    %10 = tpu.iota {dimensions = array<i32: 0>} : vector<16x128xi32>
    %11 = tpu.iota {dimensions = array<i32: 1>} : vector<16x128xi32>
    %c15_i32 = arith.constant 15 : i32
    %12 = vector.broadcast %c15_i32 : i32 to vector<16x128xi32>
    %13 = arith.andi %11, %12 : vector<16x128xi32>
    %c3_i32 = arith.constant 3 : i32
    %14 = vector.broadcast %c3_i32 : i32 to vector<16x128xi32>
    %15 = arith.shrsi %10, %14 : vector<16x128xi32>
    %c3_i32_1 = arith.constant 3 : i32
    %16 = vector.broadcast %c3_i32_1 : i32 to vector<16x128xi32>
    %17 = arith.shrsi %13, %16 : vector<16x128xi32>
    %18 = arith.cmpi eq, %15, %17 : vector<16x128xi32>
    %cst = arith.constant 0.000000e+00 : f32
    %cst_2 = arith.constant -1.000000e+30 : f32
    %19 = vector.broadcast %cst : f32 to vector<16x128xf32>
    %20 = vector.broadcast %cst_2 : f32 to vector<16x128xf32>
    %21 = arith.select %18, %19, %20 : vector<16x128xi1>, vector<16x128xf32>
    %c0_3 = arith.constant 0 : index
    %c0_4 = arith.constant 0 : index
    %22 = vector.load %arg2[%c0_3, %c0_4] : memref<336x128xf32, #tpu.memory_space<vmem>>, vector<32x96xf32>
    %c32 = arith.constant 32 : index
    %c0_5 = arith.constant 0 : index
    %23 = vector.load %arg2[%c32, %c0_5] : memref<336x128xf32, #tpu.memory_space<vmem>>, vector<32x32xf32>
    %c64 = arith.constant 64 : index
    %c0_6 = arith.constant 0 : index
    %24 = vector.load %arg2[%c64, %c0_6] : memref<336x128xf32, #tpu.memory_space<vmem>>, vector<32x64xf32>
    %c96 = arith.constant 96 : index
    %c0_7 = arith.constant 0 : index
    %25 = vector.load %arg2[%c96, %c0_7] : memref<336x128xf32, #tpu.memory_space<vmem>>, vector<64x32xf32>
    %c160 = arith.constant 160 : index
    %c0_8 = arith.constant 0 : index
    %26 = vector.load %arg2[%c160, %c0_8] : memref<336x128xf32, #tpu.memory_space<vmem>>, vector<8x128xf32>
    %27 = vector.extract_strided_slice %26 {offsets = [0, 0], sizes = [1, 32], strides = [1, 1]} : vector<8x128xf32> to vector<1x32xf32>
    %28 = vector.extract_strided_slice %26 {offsets = [1, 0], sizes = [1, 32], strides = [1, 1]} : vector<8x128xf32> to vector<1x32xf32>
    %29 = vector.extract_strided_slice %26 {offsets = [2, 0], sizes = [1, 96], strides = [1, 1]} : vector<8x128xf32> to vector<1x96xf32>
    %30 = vector.extract_strided_slice %26 {offsets = [3, 0], sizes = [1, 32], strides = [1, 1]} : vector<8x128xf32> to vector<1x32xf32>
    %31 = vector.extract_strided_slice %26 {offsets = [4, 0], sizes = [1, 32], strides = [1, 1]} : vector<8x128xf32> to vector<1x32xf32>
    %32 = vector.extract_strided_slice %26 {offsets = [5, 0], sizes = [1, 32], strides = [1, 1]} : vector<8x128xf32> to vector<1x32xf32>
    %33 = vector.extract_strided_slice %26 {offsets = [6, 0], sizes = [1, 64], strides = [1, 1]} : vector<8x128xf32> to vector<1x64xf32>
    %34 = vector.extract_strided_slice %26 {offsets = [7, 0], sizes = [1, 32], strides = [1, 1]} : vector<8x128xf32> to vector<1x32xf32>
    %cst_9 = arith.constant dense<0.000000e+00> : vector<16xf32>
    %35 = vector.multi_reduction <add>, %0, %cst_9 [1] : vector<16x32xf32> to vector<16xf32>
    %36 = vector.shape_cast %35 : vector<16xf32> to vector<16x1xf32>
    %cst_10 = arith.constant 3.200000e+01 : f32
    %37 = vector.broadcast %cst_10 : f32 to vector<16x1xf32>
    %38 = arith.divf %36, %37 : vector<16x1xf32>
    %39 = vector.broadcast %38 : vector<16x1xf32> to vector<16x32xf32>
    %40 = arith.subf %0, %39 : vector<16x32xf32>
    %41 = arith.mulf %40, %40 : vector<16x32xf32>
    %cst_11 = arith.constant dense<0.000000e+00> : vector<16xf32>
    %42 = vector.multi_reduction <add>, %41, %cst_11 [1] : vector<16x32xf32> to vector<16xf32>
    %43 = vector.shape_cast %42 : vector<16xf32> to vector<16x1xf32>
    %cst_12 = arith.constant 3.200000e+01 : f32
    %44 = vector.broadcast %cst_12 : f32 to vector<16x1xf32>
    %45 = arith.divf %43, %44 : vector<16x1xf32>
    %46 = vector.broadcast %38 : vector<16x1xf32> to vector<16x32xf32>
    %47 = arith.subf %0, %46 : vector<16x32xf32>
    %cst_13 = arith.constant 9.99999974E-6 : f32
    %48 = vector.broadcast %cst_13 : f32 to vector<16x1xf32>
    %49 = arith.addf %45, %48 : vector<16x1xf32>
    %50 = math.rsqrt %49 : vector<16x1xf32>
    %51 = vector.broadcast %50 : vector<16x1xf32> to vector<16x32xf32>
    %52 = arith.mulf %47, %51 : vector<16x32xf32>
    %53 = vector.broadcast %27 : vector<1x32xf32> to vector<16x32xf32>
    %54 = arith.mulf %52, %53 : vector<16x32xf32>
    %55 = vector.broadcast %28 : vector<1x32xf32> to vector<16x32xf32>
    %56 = arith.addf %54, %55 : vector<16x32xf32>
    %cst_14 = arith.constant dense<0.000000e+00> : vector<16x96xf32>
    %57 = tpu.matmul %56, %22, %cst_14 {dimension_numbers = #tpu.dot_dimension_numbers<[1], [0], [0], [1], [0, 0, 1, 1], [], []>} : vector<16x32xf32>, vector<32x96xf32>, vector<16x96xf32> -> vector<16x96xf32>
    %58 = vector.broadcast %29 : vector<1x96xf32> to vector<16x96xf32>
    %59 = arith.addf %57, %58 : vector<16x96xf32>
    %60 = vector.extract_strided_slice %59 {offsets = [0, 0], sizes = [16, 32], strides = [1, 1]} : vector<16x96xf32> to vector<16x32xf32>
    %61 = vector.extract_strided_slice %59 {offsets = [0, 32], sizes = [16, 32], strides = [1, 1]} : vector<16x96xf32> to vector<16x32xf32>
    %62 = vector.extract_strided_slice %59 {offsets = [0, 64], sizes = [16, 32], strides = [1, 1]} : vector<16x96xf32> to vector<16x32xf32>
    %63 = vector.shape_cast %61 : vector<16x32xf32> to vector<1x16x32xf32>
    %64 = vector.shape_cast %63 : vector<1x16x32xf32> to vector<1x16x32xf32>
    %65 = vector.broadcast %64 : vector<1x16x32xf32> to vector<8x16x32xf32>
    %66 = vector.shape_cast %65 : vector<8x16x32xf32> to vector<128x32xf32>
    %67 = arith.mulf %66, %9 : vector<128x32xf32>
    %68 = vector.shape_cast %62 : vector<16x32xf32> to vector<1x16x32xf32>
    %69 = vector.shape_cast %68 : vector<1x16x32xf32> to vector<1x16x32xf32>
    %70 = vector.broadcast %69 : vector<1x16x32xf32> to vector<8x16x32xf32>
    %71 = vector.shape_cast %70 : vector<8x16x32xf32> to vector<128x32xf32>
    %72 = arith.mulf %71, %9 : vector<128x32xf32>
    %cst_15 = arith.constant dense<0.000000e+00> : vector<16x128xf32>
    %73 = tpu.matmul %60, %67, %cst_15 {dimension_numbers = #tpu.dot_dimension_numbers<[1], [1], [0], [0], [0, 0, 1, 0], [], []>} : vector<16x32xf32>, vector<128x32xf32>, vector<16x128xf32> -> vector<16x128xf32>
    %74 = arith.addf %73, %21 : vector<16x128xf32>
    %75 = math.exp %74 : vector<16x128xf32>
    %cst_16 = arith.constant dense<0.000000e+00> : vector<16x32xf32>
    %76 = tpu.matmul %75, %72, %cst_16 {dimension_numbers = #tpu.dot_dimension_numbers<[1], [0], [0], [1], [0, 0, 1, 1], [], []>} : vector<16x128xf32>, vector<128x32xf32>, vector<16x32xf32> -> vector<16x32xf32>
    %cst_17 = arith.constant dense<0.000000e+00> : vector<16x32xf32>
    %77 = tpu.matmul %75, %9, %cst_17 {dimension_numbers = #tpu.dot_dimension_numbers<[1], [0], [0], [1], [0, 0, 1, 1], [], []>} : vector<16x128xf32>, vector<128x32xf32>, vector<16x32xf32> -> vector<16x32xf32>
    %78 = tpu.reciprocal %77 {approx = true} : vector<16x32xf32> -> vector<16x32xf32>
    %79 = arith.mulf %76, %78 : vector<16x32xf32>
    %cst_18 = arith.constant dense<0.000000e+00> : vector<16x32xf32>
    %80 = tpu.matmul %79, %23, %cst_18 {dimension_numbers = #tpu.dot_dimension_numbers<[1], [0], [0], [1], [0, 0, 1, 1], [], []>} : vector<16x32xf32>, vector<32x32xf32>, vector<16x32xf32> -> vector<16x32xf32>
    %81 = arith.addf %0, %80 : vector<16x32xf32>
    %82 = vector.broadcast %30 : vector<1x32xf32> to vector<16x32xf32>
    %83 = arith.addf %81, %82 : vector<16x32xf32>
    %cst_19 = arith.constant dense<0.000000e+00> : vector<16xf32>
    %84 = vector.multi_reduction <add>, %83, %cst_19 [1] : vector<16x32xf32> to vector<16xf32>
    %85 = vector.shape_cast %84 : vector<16xf32> to vector<16x1xf32>
    %cst_20 = arith.constant 3.200000e+01 : f32
    %86 = vector.broadcast %cst_20 : f32 to vector<16x1xf32>
    %87 = arith.divf %85, %86 : vector<16x1xf32>
    %88 = vector.broadcast %87 : vector<16x1xf32> to vector<16x32xf32>
    %89 = arith.subf %83, %88 : vector<16x32xf32>
    %90 = arith.mulf %89, %89 : vector<16x32xf32>
    %cst_21 = arith.constant dense<0.000000e+00> : vector<16xf32>
    %91 = vector.multi_reduction <add>, %90, %cst_21 [1] : vector<16x32xf32> to vector<16xf32>
    %92 = vector.shape_cast %91 : vector<16xf32> to vector<16x1xf32>
    %cst_22 = arith.constant 3.200000e+01 : f32
    %93 = vector.broadcast %cst_22 : f32 to vector<16x1xf32>
    %94 = arith.divf %92, %93 : vector<16x1xf32>
    %95 = vector.broadcast %87 : vector<16x1xf32> to vector<16x32xf32>
    %96 = arith.subf %83, %95 : vector<16x32xf32>
    %cst_23 = arith.constant 9.99999974E-6 : f32
    %97 = vector.broadcast %cst_23 : f32 to vector<16x1xf32>
    %98 = arith.addf %94, %97 : vector<16x1xf32>
    %99 = math.rsqrt %98 : vector<16x1xf32>
    %100 = vector.broadcast %99 : vector<16x1xf32> to vector<16x32xf32>
    %101 = arith.mulf %96, %100 : vector<16x32xf32>
    %102 = vector.broadcast %31 : vector<1x32xf32> to vector<16x32xf32>
    %103 = arith.mulf %101, %102 : vector<16x32xf32>
    %104 = vector.broadcast %32 : vector<1x32xf32> to vector<16x32xf32>
    %105 = arith.addf %103, %104 : vector<16x32xf32>
    %cst_24 = arith.constant dense<0.000000e+00> : vector<16x64xf32>
    %106 = tpu.matmul %105, %24, %cst_24 {dimension_numbers = #tpu.dot_dimension_numbers<[1], [0], [0], [1], [0, 0, 1, 1], [], []>} : vector<16x32xf32>, vector<32x64xf32>, vector<16x64xf32> -> vector<16x64xf32>
    %107 = vector.broadcast %33 : vector<1x64xf32> to vector<16x64xf32>
    %108 = arith.addf %106, %107 : vector<16x64xf32>
    %109 = arith.mulf %108, %108 : vector<16x64xf32>
    %110 = arith.mulf %108, %109 : vector<16x64xf32>
    %cst_25 = arith.constant 4.471500e-02 : f32
    %111 = vector.broadcast %cst_25 : f32 to vector<16x64xf32>
    %112 = arith.mulf %111, %110 : vector<16x64xf32>
    %113 = arith.addf %108, %112 : vector<16x64xf32>
    %cst_26 = arith.constant 0.797884583 : f32
    %114 = vector.broadcast %cst_26 : f32 to vector<16x64xf32>
    %115 = arith.mulf %114, %113 : vector<16x64xf32>
    %116 = math.tanh %115 : vector<16x64xf32>
    %cst_27 = arith.constant 1.000000e+00 : f32
    %117 = vector.broadcast %cst_27 : f32 to vector<16x64xf32>
    %118 = arith.addf %117, %116 : vector<16x64xf32>
    %cst_28 = arith.constant 5.000000e-01 : f32
    %119 = vector.broadcast %cst_28 : f32 to vector<16x64xf32>
    %120 = arith.mulf %119, %118 : vector<16x64xf32>
    %121 = arith.mulf %108, %120 : vector<16x64xf32>
    %cst_29 = arith.constant dense<0.000000e+00> : vector<16x32xf32>
    %122 = tpu.matmul %121, %25, %cst_29 {dimension_numbers = #tpu.dot_dimension_numbers<[1], [0], [0], [1], [0, 0, 1, 1], [], []>} : vector<16x64xf32>, vector<64x32xf32>, vector<16x32xf32> -> vector<16x32xf32>
    %123 = arith.addf %83, %122 : vector<16x32xf32>
    %124 = vector.broadcast %34 : vector<1x32xf32> to vector<16x32xf32>
    %125 = arith.addf %123, %124 : vector<16x32xf32>
    %c168 = arith.constant 168 : index
    %c0_30 = arith.constant 0 : index
    %126 = vector.load %arg2[%c168, %c0_30] : memref<336x128xf32, #tpu.memory_space<vmem>>, vector<32x96xf32>
    %c200 = arith.constant 200 : index
    %c0_31 = arith.constant 0 : index
    %127 = vector.load %arg2[%c200, %c0_31] : memref<336x128xf32, #tpu.memory_space<vmem>>, vector<32x32xf32>
    %c232 = arith.constant 232 : index
    %c0_32 = arith.constant 0 : index
    %128 = vector.load %arg2[%c232, %c0_32] : memref<336x128xf32, #tpu.memory_space<vmem>>, vector<32x64xf32>
    %c264 = arith.constant 264 : index
    %c0_33 = arith.constant 0 : index
    %129 = vector.load %arg2[%c264, %c0_33] : memref<336x128xf32, #tpu.memory_space<vmem>>, vector<64x32xf32>
    %c328 = arith.constant 328 : index
    %c0_34 = arith.constant 0 : index
    %130 = vector.load %arg2[%c328, %c0_34] : memref<336x128xf32, #tpu.memory_space<vmem>>, vector<8x128xf32>
    %131 = vector.extract_strided_slice %130 {offsets = [0, 0], sizes = [1, 32], strides = [1, 1]} : vector<8x128xf32> to vector<1x32xf32>
    %132 = vector.extract_strided_slice %130 {offsets = [1, 0], sizes = [1, 32], strides = [1, 1]} : vector<8x128xf32> to vector<1x32xf32>
    %133 = vector.extract_strided_slice %130 {offsets = [2, 0], sizes = [1, 96], strides = [1, 1]} : vector<8x128xf32> to vector<1x96xf32>
    %134 = vector.extract_strided_slice %130 {offsets = [3, 0], sizes = [1, 32], strides = [1, 1]} : vector<8x128xf32> to vector<1x32xf32>
    %135 = vector.extract_strided_slice %130 {offsets = [4, 0], sizes = [1, 32], strides = [1, 1]} : vector<8x128xf32> to vector<1x32xf32>
    %136 = vector.extract_strided_slice %130 {offsets = [5, 0], sizes = [1, 32], strides = [1, 1]} : vector<8x128xf32> to vector<1x32xf32>
    %137 = vector.extract_strided_slice %130 {offsets = [6, 0], sizes = [1, 64], strides = [1, 1]} : vector<8x128xf32> to vector<1x64xf32>
    %138 = vector.extract_strided_slice %130 {offsets = [7, 0], sizes = [1, 32], strides = [1, 1]} : vector<8x128xf32> to vector<1x32xf32>
    %cst_35 = arith.constant dense<0.000000e+00> : vector<16xf32>
    %139 = vector.multi_reduction <add>, %125, %cst_35 [1] : vector<16x32xf32> to vector<16xf32>
    %140 = vector.shape_cast %139 : vector<16xf32> to vector<16x1xf32>
    %cst_36 = arith.constant 3.200000e+01 : f32
    %141 = vector.broadcast %cst_36 : f32 to vector<16x1xf32>
    %142 = arith.divf %140, %141 : vector<16x1xf32>
    %143 = vector.broadcast %142 : vector<16x1xf32> to vector<16x32xf32>
    %144 = arith.subf %125, %143 : vector<16x32xf32>
    %145 = arith.mulf %144, %144 : vector<16x32xf32>
    %cst_37 = arith.constant dense<0.000000e+00> : vector<16xf32>
    %146 = vector.multi_reduction <add>, %145, %cst_37 [1] : vector<16x32xf32> to vector<16xf32>
    %147 = vector.shape_cast %146 : vector<16xf32> to vector<16x1xf32>
    %cst_38 = arith.constant 3.200000e+01 : f32
    %148 = vector.broadcast %cst_38 : f32 to vector<16x1xf32>
    %149 = arith.divf %147, %148 : vector<16x1xf32>
    %150 = vector.broadcast %142 : vector<16x1xf32> to vector<16x32xf32>
    %151 = arith.subf %125, %150 : vector<16x32xf32>
    %cst_39 = arith.constant 9.99999974E-6 : f32
    %152 = vector.broadcast %cst_39 : f32 to vector<16x1xf32>
    %153 = arith.addf %149, %152 : vector<16x1xf32>
    %154 = math.rsqrt %153 : vector<16x1xf32>
    %155 = vector.broadcast %154 : vector<16x1xf32> to vector<16x32xf32>
    %156 = arith.mulf %151, %155 : vector<16x32xf32>
    %157 = vector.broadcast %131 : vector<1x32xf32> to vector<16x32xf32>
    %158 = arith.mulf %156, %157 : vector<16x32xf32>
    %159 = vector.broadcast %132 : vector<1x32xf32> to vector<16x32xf32>
    %160 = arith.addf %158, %159 : vector<16x32xf32>
    %cst_40 = arith.constant dense<0.000000e+00> : vector<16x96xf32>
    %161 = tpu.matmul %160, %126, %cst_40 {dimension_numbers = #tpu.dot_dimension_numbers<[1], [0], [0], [1], [0, 0, 1, 1], [], []>} : vector<16x32xf32>, vector<32x96xf32>, vector<16x96xf32> -> vector<16x96xf32>
    %162 = vector.broadcast %133 : vector<1x96xf32> to vector<16x96xf32>
    %163 = arith.addf %161, %162 : vector<16x96xf32>
    %164 = vector.extract_strided_slice %163 {offsets = [0, 0], sizes = [16, 32], strides = [1, 1]} : vector<16x96xf32> to vector<16x32xf32>
    %165 = vector.extract_strided_slice %163 {offsets = [0, 32], sizes = [16, 32], strides = [1, 1]} : vector<16x96xf32> to vector<16x32xf32>
    %166 = vector.extract_strided_slice %163 {offsets = [0, 64], sizes = [16, 32], strides = [1, 1]} : vector<16x96xf32> to vector<16x32xf32>
    %167 = vector.shape_cast %165 : vector<16x32xf32> to vector<1x16x32xf32>
    %168 = vector.shape_cast %167 : vector<1x16x32xf32> to vector<1x16x32xf32>
    %169 = vector.broadcast %168 : vector<1x16x32xf32> to vector<8x16x32xf32>
    %170 = vector.shape_cast %169 : vector<8x16x32xf32> to vector<128x32xf32>
    %171 = arith.mulf %170, %9 : vector<128x32xf32>
    %172 = vector.shape_cast %166 : vector<16x32xf32> to vector<1x16x32xf32>
    %173 = vector.shape_cast %172 : vector<1x16x32xf32> to vector<1x16x32xf32>
    %174 = vector.broadcast %173 : vector<1x16x32xf32> to vector<8x16x32xf32>
    %175 = vector.shape_cast %174 : vector<8x16x32xf32> to vector<128x32xf32>
    %176 = arith.mulf %175, %9 : vector<128x32xf32>
    %cst_41 = arith.constant dense<0.000000e+00> : vector<16x128xf32>
    %177 = tpu.matmul %164, %171, %cst_41 {dimension_numbers = #tpu.dot_dimension_numbers<[1], [1], [0], [0], [0, 0, 1, 0], [], []>} : vector<16x32xf32>, vector<128x32xf32>, vector<16x128xf32> -> vector<16x128xf32>
    %178 = arith.addf %177, %21 : vector<16x128xf32>
    %179 = math.exp %178 : vector<16x128xf32>
    %cst_42 = arith.constant dense<0.000000e+00> : vector<16x32xf32>
    %180 = tpu.matmul %179, %176, %cst_42 {dimension_numbers = #tpu.dot_dimension_numbers<[1], [0], [0], [1], [0, 0, 1, 1], [], []>} : vector<16x128xf32>, vector<128x32xf32>, vector<16x32xf32> -> vector<16x32xf32>
    %cst_43 = arith.constant dense<0.000000e+00> : vector<16x32xf32>
    %181 = tpu.matmul %179, %9, %cst_43 {dimension_numbers = #tpu.dot_dimension_numbers<[1], [0], [0], [1], [0, 0, 1, 1], [], []>} : vector<16x128xf32>, vector<128x32xf32>, vector<16x32xf32> -> vector<16x32xf32>
    %182 = tpu.reciprocal %181 {approx = true} : vector<16x32xf32> -> vector<16x32xf32>
    %183 = arith.mulf %180, %182 : vector<16x32xf32>
    %cst_44 = arith.constant dense<0.000000e+00> : vector<16x32xf32>
    %184 = tpu.matmul %183, %127, %cst_44 {dimension_numbers = #tpu.dot_dimension_numbers<[1], [0], [0], [1], [0, 0, 1, 1], [], []>} : vector<16x32xf32>, vector<32x32xf32>, vector<16x32xf32> -> vector<16x32xf32>
    %185 = arith.addf %125, %184 : vector<16x32xf32>
    %186 = vector.broadcast %134 : vector<1x32xf32> to vector<16x32xf32>
    %187 = arith.addf %185, %186 : vector<16x32xf32>
    %cst_45 = arith.constant dense<0.000000e+00> : vector<16xf32>
    %188 = vector.multi_reduction <add>, %187, %cst_45 [1] : vector<16x32xf32> to vector<16xf32>
    %189 = vector.shape_cast %188 : vector<16xf32> to vector<16x1xf32>
    %cst_46 = arith.constant 3.200000e+01 : f32
    %190 = vector.broadcast %cst_46 : f32 to vector<16x1xf32>
    %191 = arith.divf %189, %190 : vector<16x1xf32>
    %192 = vector.broadcast %191 : vector<16x1xf32> to vector<16x32xf32>
    %193 = arith.subf %187, %192 : vector<16x32xf32>
    %194 = arith.mulf %193, %193 : vector<16x32xf32>
    %cst_47 = arith.constant dense<0.000000e+00> : vector<16xf32>
    %195 = vector.multi_reduction <add>, %194, %cst_47 [1] : vector<16x32xf32> to vector<16xf32>
    %196 = vector.shape_cast %195 : vector<16xf32> to vector<16x1xf32>
    %cst_48 = arith.constant 3.200000e+01 : f32
    %197 = vector.broadcast %cst_48 : f32 to vector<16x1xf32>
    %198 = arith.divf %196, %197 : vector<16x1xf32>
    %199 = vector.broadcast %191 : vector<16x1xf32> to vector<16x32xf32>
    %200 = arith.subf %187, %199 : vector<16x32xf32>
    %cst_49 = arith.constant 9.99999974E-6 : f32
    %201 = vector.broadcast %cst_49 : f32 to vector<16x1xf32>
    %202 = arith.addf %198, %201 : vector<16x1xf32>
    %203 = math.rsqrt %202 : vector<16x1xf32>
    %204 = vector.broadcast %203 : vector<16x1xf32> to vector<16x32xf32>
    %205 = arith.mulf %200, %204 : vector<16x32xf32>
    %206 = vector.broadcast %135 : vector<1x32xf32> to vector<16x32xf32>
    %207 = arith.mulf %205, %206 : vector<16x32xf32>
    %208 = vector.broadcast %136 : vector<1x32xf32> to vector<16x32xf32>
    %209 = arith.addf %207, %208 : vector<16x32xf32>
    %cst_50 = arith.constant dense<0.000000e+00> : vector<16x64xf32>
    %210 = tpu.matmul %209, %128, %cst_50 {dimension_numbers = #tpu.dot_dimension_numbers<[1], [0], [0], [1], [0, 0, 1, 1], [], []>} : vector<16x32xf32>, vector<32x64xf32>, vector<16x64xf32> -> vector<16x64xf32>
    %211 = vector.broadcast %137 : vector<1x64xf32> to vector<16x64xf32>
    %212 = arith.addf %210, %211 : vector<16x64xf32>
    %213 = arith.mulf %212, %212 : vector<16x64xf32>
    %214 = arith.mulf %212, %213 : vector<16x64xf32>
    %cst_51 = arith.constant 4.471500e-02 : f32
    %215 = vector.broadcast %cst_51 : f32 to vector<16x64xf32>
    %216 = arith.mulf %215, %214 : vector<16x64xf32>
    %217 = arith.addf %212, %216 : vector<16x64xf32>
    %cst_52 = arith.constant 0.797884583 : f32
    %218 = vector.broadcast %cst_52 : f32 to vector<16x64xf32>
    %219 = arith.mulf %218, %217 : vector<16x64xf32>
    %220 = math.tanh %219 : vector<16x64xf32>
    %cst_53 = arith.constant 1.000000e+00 : f32
    %221 = vector.broadcast %cst_53 : f32 to vector<16x64xf32>
    %222 = arith.addf %221, %220 : vector<16x64xf32>
    %cst_54 = arith.constant 5.000000e-01 : f32
    %223 = vector.broadcast %cst_54 : f32 to vector<16x64xf32>
    %224 = arith.mulf %223, %222 : vector<16x64xf32>
    %225 = arith.mulf %212, %224 : vector<16x64xf32>
    %cst_55 = arith.constant dense<0.000000e+00> : vector<16x32xf32>
    %226 = tpu.matmul %225, %129, %cst_55 {dimension_numbers = #tpu.dot_dimension_numbers<[1], [0], [0], [1], [0, 0, 1, 1], [], []>} : vector<16x64xf32>, vector<64x32xf32>, vector<16x32xf32> -> vector<16x32xf32>
    %227 = arith.addf %187, %226 : vector<16x32xf32>
    %228 = vector.broadcast %138 : vector<1x32xf32> to vector<16x32xf32>
    %229 = arith.addf %227, %228 : vector<16x32xf32>
    %c0_56 = arith.constant 0 : index
    %c0_57 = arith.constant 0 : index
    %230 = vector.load %arg3[%c0_56, %c0_57] : memref<16x32xf32, #tpu.memory_space<vmem>>, vector<16x32xf32>
    tpu.vector_store %arg3[%c0_56, %c0_57], %229 {strides = array<i32>} : memref<16x32xf32, #tpu.memory_space<vmem>>, vector<16x32xf32>,
    return
  }
  func.func @transform_0(%arg0: i32) -> (i32, i32) {
    %c0_i32 = arith.constant 0 : i32
    %c0_i32_0 = arith.constant 0 : i32
    return %arg0, %c0_i32 : i32, i32
  }
  func.func @transform_1(%arg0: i32) -> (i32, i32) {
    %c0_i32 = arith.constant 0 : i32
    %c0_i32_0 = arith.constant 0 : i32
    %c0_i32_1 = arith.constant 0 : i32
    return %c0_i32, %c0_i32_0 : i32, i32
  }
  func.func @transform_2(%arg0: i32) -> (i32, i32) {
    %c0_i32 = arith.constant 0 : i32
    %c0_i32_0 = arith.constant 0 : i32
    return %arg0, %c0_i32 : i32, i32
  }
}

</mosaic_0001>

<bundles_post_ra>
// kernel: tpu_custom_call.1
= control target key start
LH: loop header
LB: loop body
LE: loop exit
PB: predicated region body
PF: predicated region fallthrough
CT: control target
= control target key end

     0   :  { %7 = vsyncpa [#allocation3], 0  ;;  %s2565_s0 = inlined_call_operand.hbm [shape: f32[16,32], index: 0, kind: input, shape index: {}]   ;;  %s2566_s1 = inlined_call_operand.hbm [shape: f32[336,128], index: 1, kind: input, shape index: {}]   ;;  %s2567_s2 = inlined_call_operand.hbm [shape: f32[16,32], index: 2, kind: output, shape index: {}]  }
   0x1   :  { %8 = vsyncpa [#allocation6], 0 }
   0x2   :  { %9 = vsyncpa [#allocation4], 0  ;;  %s14_s11 = sshll.u32 %s2565_s0, 4  ;;  %s1725_s12 = smov [#allocation2]   ;;  %s15_s11 = int_to_ptr.hbm [resolvable:$true] %s14_s11 }
   0x3   :  { %s16_s13 = sshll.u32 %s1725_s12, 4  ;;  %s27_s16 = sshll.u32 %s2566_s1, 4  ;;  %s17_s13 = int_to_ptr.vmem [resolvable:$true] %s16_s13  ;;  %s28_s16 = int_to_ptr.hbm [resolvable:$true] %s27_s16 }
   0x4   :  { %s1726_s17 = smov 128   ;;  %s1727_s18 = smov 8  }
   0x5   :  { %22 = dma.hbm_to_vmem [thread:$0]  %s15_s11, 256, %s17_s13, [#allocation3], %s1726_s17, %s1726_s17, %s1727_s18  }
   0x6   :  { %s1728_s19 = smov [#allocation5]  }
   0x7   :  { %s29_s20 = sshll.u32 %s1728_s19, 4  ;;  %s30_s20 = int_to_ptr.vmem [resolvable:$true] %s29_s20 }
   0x8   :  { %35 = dma.hbm_to_vmem [thread:$0]  %s28_s16, 5376, %s30_s20, [#allocation6], %s1726_s17, %s1726_s17, %s1727_s18  }
   0x9   :  { %1719 = dma.done.wait [#allocation3], 256  }
   0xa   :  { %1720 = vsyncadd [#allocation3], 4294967040 }
   0xb   :  { %1721 = dma.done.wait [#allocation6], 5376  }
   0xc   :  { %1722 = vsyncadd [#allocation6], 4294961920  ;;  %vm2568_vm0 = vcmask 261120   ;;  %v1764_v0 = vld [vmem:[#allocation2] sm:$0xff]  ;;  %v1768_v2 = vld [vmem:[#allocation2 + $0x8] sm:$0xff]  ;;  %v1729_v4 = vmov 32.0   ;;  %v46_v27 = vlaneseq }
   0xd   :  { %v160_v1 = vsel %vm2568_vm0, %v1764_v0, 0.0  ;;  %v163_v3 = vsel %vm2568_vm0, %v1768_v2, 0.0  ;;  %1605 = vrcp.f32 %v1729_v4  ;;  %v141_v21 = vld [vmem:[#allocation5 + $0x18] sm:$0xff]  ;;  %v140_v22 = vld [vmem:[#allocation5 + $0x10] sm:$0xff]  ;;  %v139_v23 = vld [vmem:[#allocation5 + $0x8] sm:$0xff]  ;;  %v1730_v54 = vmov 0.0  }
   0xe   :  { %161 = vadd.xlane.f32.xlu0 %v160_v1  ;;  %236 = vmatpush.msra.mxu3 %v141_v21  ;;  %v138_v24 = vld [vmem:[#allocation5] sm:$0xff]  ;;  %v1791_v29 = vshrl.u32 %v46_v27, 7  ;;  %v1794_v30 = vand.u32 127, %v46_v27  ;;  %s1731_s0 = smov 32   ;;  %s1732_s1 = smov 96   ;;  %v2354_v1 = vld [vmem:[#allocation5 + $0x148] sm:$0xff] }
   0xf   :  { %s1733_s21 = smov 64   ;;  %s1736_s22 = smov [#allocation7]  }
  0x10   :  { %237 = vmatpush.msra.mxu3 %v140_v22  ;;  %v61_v31 = vadd.s32 112, %v1791_v29  ;;  %v62_v32 = vadd.s32 120, %v1791_v29  ;;  %v57_v33 = vadd.s32 80, %v1791_v29  ;;  %v58_v34 = vadd.s32 88, %v1791_v29  ;;  %s1317_s23 = sshll.u32 %s1736_s22, 4  ;;  %s1319_s26 = sshll.u32 %s2567_s2, 4  ;;  %s1318_s23 = int_to_ptr.vmem [resolvable:$true] %s1317_s23  ;;  %s1320_s26 = int_to_ptr.hbm [resolvable:$true] %s1319_s26 }
  0x11   :  { %v1801_v35 = vshra.s32 %v1794_v30, 2  ;;  %v55_v36 = vadd.s32 64, %v1791_v29  ;;  %v56_v37 = vadd.s32 72, %v1791_v29  ;;  %v59_v38 = vadd.s32 96, %v1791_v29 }
  0x12   :  { %238 = vmatpush.msra.mxu3 %v139_v23  ;;  %v79_v40 = vshra.s32 %v61_v31, 4  ;;  %v80_v41 = vshra.s32 %v62_v32, 4  ;;  %v75_v42 = vshra.s32 %v57_v33, 4  ;;  %v76_v43 = vshra.s32 %v58_v34, 4 }
  0x13   :  { %v1606_v5 = vpop.eup %1605  ;;  %v73_v45 = vshra.s32 %v55_v36, 4  ;;  %v74_v46 = vshra.s32 %v56_v37, 4  ;;  %v60_v47 = vadd.s32 104, %v1791_v29  ;;  %v2627_v31 = vmov 0 }
  0x14   :  { %v167_v6 = vmul.f32 32.0, %v1606_v5  ;;  %vm171_vm1 = vweird.f32 %v1606_v5  ;;  %239 = vmatpush.msra.mxu3 %v138_v24  ;;  %vm1809_vm2 = vcmp.eq.s32.totalorder %v79_v40, %v1801_v35  ;;  %vm1814_vm3 = vcmp.eq.s32.totalorder %v80_v41, %v1801_v35 }
  0x15   :  { %vm1819_vm4 = vcmp.eq.s32.totalorder %v75_v42, %v1801_v35  ;;  %vm1824_vm5 = vcmp.eq.s32.totalorder %v76_v43, %v1801_v35  ;;  %v1347_v55 = vsel %vm1809_vm2, 1.0, %v1730_v54  ;;  %v1348_v56 = vsel %vm1814_vm3, 1.0, %v1730_v54 }
  0x16   :  { %164 = vadd.xlane.f32.xlu0 %v163_v3  ;;  %v168_v7 = vsub.f32 1.0, %v167_v6  ;;  %v1343_v57 = vsel %vm1819_vm4, 1.0, %v1730_v54  ;;  %v1840_v59 = vpack.i.bf16 %v1347_v55, %v1348_v56  ;;  %v1344_v60 = vsel %vm1824_vm5, 1.0, %v1730_v54 }
  0x17   :  { %vm1847_vm6 = vcmp.eq.s32.totalorder %v73_v45, %v1801_v35  ;;  %v1853_v63 = vpack.i.bf16 %v1343_v57, %v1344_v60  ;;  %vm1856_vm7 = vcmp.eq.s32.totalorder %v74_v46, %v1801_v35  ;;  %v78_v6 = vshra.s32 %v60_v47, 4 }
  0x18   :  { %v169_v8 = vmul.f32 %v1606_v5, %v168_v7  ;;  %1446 = vrot.lane.b32.xlu2 %v1840_v59, %s1731_s0  ;;  %v1341_v3 = vsel %vm1847_vm6, 1.0, %v1730_v54  ;;  %v1342_v4 = vsel %vm1856_vm7, 1.0, %v1730_v54  ;;  %v53_v7 = vadd.s32 48, %v1791_v29 }
  0x19   :  { %vm1878_vm10 = vcmp.eq.s32.totalorder %v78_v6, %v1801_v35  ;;  %v51_v24 = vadd.s32 32, %v1791_v29  ;;  %v2631_v47 = vmov 0  ;;  %v850_v32 = vperm.slane %v2354_v1, 0 }
  0x1a   :  { %v170_v9 = vadd.f32 %v1606_v5, %v169_v8 }
  0x1b   :  { %v69_v41 = vshra.s32 %v51_v24, 4 }
  0x1c   :  { %v1772_v10 = vsel %vm171_vm1, %v1606_v5, %v170_v9  ;;  %v77_v5 = vshra.s32 %v59_v38, 4  ;;  %v1869_v9 = vpack.i.bf16 %v1341_v3, %v1342_v4 }
  0x1e   :  { %vm1873_vm9 = vcmp.eq.s32.totalorder %v77_v5, %v1801_v35 }
  0x2a   :  { %1456 = vrot.lane.b32.xlu0 %v1853_v63, %s1731_s0 }
  0x72   :  { %v1948_v3 = vpop.permute.xlu2 %1446 }
  0x73   :  { %v1449_v4 = vunpack.i.h.bf16 %v1948_v3 }
  0x81   :  { %v162_v11 = vpop.xlane.xlu0 %161 }
  0x82   :  { %v173_v12 = vmul.f32 %v1772_v10, %v162_v11  ;;  %v54_v11 = vadd.s32 56, %v1791_v29 }
  0x84   :  { %v1776_v13 = vsub.f32 %v1764_v0, %v173_v12  ;;  %v72_v21 = vshra.s32 %v54_v11, 4 }
  0x86   :  { %v177_v14 = vmul.f32 %v1776_v13, %v1776_v13  ;;  %vm1904_vm13 = vcmp.eq.s32.totalorder %v72_v21, %v1801_v35 }
  0x88   :  { %v179_v15 = vsel %vm2568_vm0, %v177_v14, 0.0 }
  0x89   :  { %180 = vadd.xlane.f32.xlu1 %v179_v15  ;;  %v165_v16 = vpop.xlane.xlu0 %164  ;;  %v71_v15 = vshra.s32 %v53_v7, 4  ;;  %v49_v7 = vadd.s32 16, %v1791_v29 }
  0x8a   :  { %v174_v17 = vmul.f32 %v1772_v10, %v165_v16 }
  0x8b   :  { %vm1899_vm12 = vcmp.eq.s32.totalorder %v71_v15, %v1801_v35 }
  0x8c   :  { %v1783_v18 = vsub.f32 %v1768_v2, %v174_v17  ;;  %v1882_v17 = vld [vmem:[#allocation5 + $0xa0] sm:$0xff]  ;;  %v2628_v31 = vsel %vm1899_vm12, 4294967295, %v2627_v31  ;;  %v1339_v38 = vsel %vm1899_vm12, 1.0, %v1730_v54 }
  0x8d   :  { %v214_v37 = vperm.slane %v1882_v17, 1 }
  0x8e   :  { %v178_v19 = vmul.f32 %v1783_v18, %v1783_v18 }
  0x90   :  { %v182_v20 = vsel %vm2568_vm0, %v178_v19, 0.0  ;;  %v1345_v19 = vsel %vm1873_vm9, 1.0, %v1730_v54 }
  0x91   :  { %183 = vadd.xlane.f32.xlu1 %v182_v20  ;;  %v1346_v20 = vsel %vm1878_vm10, 1.0, %v1730_v54 }
  0x92   :  { %v1893_v23 = vpack.i.bf16 %v1345_v19, %v1346_v20  ;;  %v1448_v20 = vunpack.i.l.bf16 %v1948_v3 }
  0x94   :  { %1451 = vrot.lane.b32.xlu2 %v1893_v23, %s1731_s0 }
  0xaa   :  { %1461 = vrot.lane.b32.xlu1 %v1869_v9, %s1731_s0 }
  0xee   :  { %v1960_v15 = vpop.permute.xlu2 %1451 }
  0xef   :  { %v1454_v21 = vunpack.i.h.bf16 %v1960_v15 }
  0xfc   :  { %v181_v25 = vpop.xlane.xlu1 %180 }
  0xfd   :  { %v185_v26 = vmul.f32 %v181_v25, %v1772_v10  ;;  %v52_v25 = vadd.s32 40, %v1791_v29 }
  0xff   :  { %v1789_v28 = vadd.f32 1e-05, %v185_v26  ;;  %v70_v42 = vshra.s32 %v52_v25, 4 }
 0x101   :  { %1607 = vrsqrt.f32 %v1789_v28  ;;  %vm195_vm11 = vweird.f32 %v1789_v28 }
 0x104   :  { %v184_v39 = vpop.xlane.xlu1 %183 }
 0x105   :  { %v186_v44 = vmul.f32 %v184_v39, %v1772_v10  ;;  %v1340_v39 = vsel %vm1904_vm13, 1.0, %v1730_v54 }
 0x106   :  { %v1920_v45 = vpack.i.bf16 %v1339_v38, %v1340_v39 }
 0x107   :  { %v1608_v52 = vpop.eup %1607  ;;  %v1828_v53 = vadd.f32 1e-05, %v186_v44 }
 0x108   :  { %v190_v58 = vmul.f32 %v1608_v52, %v1789_v28  ;;  %vm196_vm8 = vweird.f32 %v1608_v52  ;;  %v211_v28 = vperm.slane %v1882_v17, 0  ;;  %1466 = vrot.lane.b32.xlu2 %v1920_v45, %s1731_s0 }
 0x109   :  { %1609 = vrsqrt.f32 %v1828_v53  ;;  %vm197_vm14 = vmor %vm195_vm11, %vm196_vm8  ;;  %vm205_vm1 = vweird.f32 %v1828_v53  ;;  %vm1924_vm8 = vcmp.eq.s32.totalorder %v69_v41, %v1801_v35  ;;  %vm1929_vm11 = vcmp.eq.s32.totalorder %v70_v42, %v1801_v35 }
 0x10a   :  { %v191_v62 = vmul.f32 %v1608_v52, %v190_v58  ;;  %v2632_v47 = vsel %vm1924_vm8, 4294967295, %v2631_v47  ;;  %v1338_v57 = vsel %vm1929_vm11, 1.0, %v1730_v54  ;;  %v65_v41 = vshra.s32 %v1791_v29, 4 }
 0x10c   :  { %v192_v8 = vmul.f32 0.5, %v191_v62 }
 0x10e   :  { %v193_v16 = vsub.f32 1.5, %v192_v8  ;;  %v50_v8 = vadd.s32 24, %v1791_v29 }
 0x10f   :  { %v1610_v22 = vpop.eup %1609 }
 0x110   :  { %v194_v26 = vmul.f32 %v1608_v52, %v193_v16  ;;  %v200_v27 = vmul.f32 %v1610_v22, %v1828_v53  ;;  %vm206_vm15 = vweird.f32 %v1610_v22  ;;  %v1337_v53 = vsel %vm1924_vm8, 1.0, %v1730_v54 }
 0x111   :  { %v1943_v60 = vpack.i.bf16 %v1337_v53, %v1338_v57  ;;  %v67_v16 = vshra.s32 %v49_v7, 4  ;;  %v68_v19 = vshra.s32 %v50_v8, 4 }
 0x112   :  { %v198_v33 = vsel %vm197_vm14, %v1608_v52, %v194_v26  ;;  %v201_v34 = vmul.f32 %v1610_v22, %v200_v27  ;;  %v2633_v52 = vmov 0  ;;  %vm207_vm14 = vmor %vm205_vm1, %vm206_vm15  ;;  %v2635_v26 = vmov 0 }
 0x113   :  { %v209_v36 = vmul.f32 %v198_v33, %v1776_v13  ;;  %v2634_v52 = vsel %vm1929_vm11, 4294967295, %v2633_v52  ;;  %1471 = vrot.lane.b32.xlu2 %v1943_v60, %s1731_s0  ;;  %vm1968_vm15 = vcmp.eq.s32.totalorder %v67_v16, %v1801_v35  ;;  %vm1973_vm1 = vcmp.eq.s32.totalorder %v68_v19, %v1801_v35 }
 0x114   :  { %v202_v40 = vmul.f32 0.5, %v201_v34  ;;  %v2636_v26 = vsel %vm1968_vm15, 4294967295, %v2635_v26  ;;  %v2637_v27 = vmov 0  ;;  %v1335_v38 = vsel %vm1968_vm15, 1.0, %v1730_v54 }
 0x115   :  { %v212_v43 = vmul.f32 %v211_v28, %v209_v36  ;;  %v2638_v27 = vsel %vm1973_vm1, 4294967295, %v2637_v27  ;;  %v1987_v36 = vadd.s32 8, %v1791_v29  ;;  %v1336_v39 = vsel %vm1973_vm1, 1.0, %v1730_v54 }
 0x116   :  { %v203_v44 = vsub.f32 1.5, %v202_v40 }
 0x117   :  { %v215_v46 = vadd.f32 %v214_v37, %v212_v43  ;;  %v66_v42 = vshra.s32 %v1987_v36, 4 }
 0x118   :  { %v204_v13 = vmul.f32 %v1610_v22, %v203_v44  ;;  %v2004_v44 = vpack.i.bf16 %v1335_v38, %v1336_v39 }
 0x119   :  { %1349 = vmatmul.msk.f32.vlgmr.msra.gmra.mxu3 %vm2568_vm0, %v215_v46 }
 0x11a   :  { %v208_v55 = vsel %vm207_vm14, %v1610_v22, %v204_v13  ;;  %v1453_v22 = vunpack.i.l.bf16 %v1960_v15  ;;  %vm2012_vm14 = vcmp.eq.s32.totalorder %v65_v41, %v1801_v35 }
 0x11b   :  { %v210_v56 = vmul.f32 %v208_v55, %v1783_v18  ;;  %v217_v18 = vperm.slane %v1882_v17, 2  ;;  %v2639_v55 = vmov 0 }
 0x11c   :  { %v2640_v55 = vsel %vm2012_vm14, 4294967295, %v2639_v55  ;;  %v2024_v57 = vpop.permute.xlu1 %1461 }
 0x11d   :  { %v213_v58 = vmul.f32 %v211_v28, %v210_v56  ;;  %v2641_v56 = vmov 0  ;;  %v2609_v16 = vunpack.i.l.bf16 %v2024_v57  ;;  %v2687_v15 = vunpack.i.h.bf16 %v2024_v57 }
 0x11f   :  { %v216_v62 = vadd.f32 %v214_v37, %v213_v58  ;;  %v1989_v37 = vpop.permute.xlu0 %1456 }
 0x120   :  { %v2608_v40 = vunpack.i.h.bf16 %v1989_v37  ;;  %v2610_v43 = vunpack.i.l.bf16 %v1989_v37  ;;  %v2686_v3 = vunpack.i.h.bf16 %v1989_v37 }
 0x121   :  { %1350 = vmatmul.msk.f32.gmra.mxu3 %vm2568_vm0, %v216_v62  ;;  %vm2017_vm0 = vcmp.eq.s32.totalorder %v66_v42, %v1801_v35  ;;  %v1333_v35 = vsel %vm2012_vm14, 1.0, %v1730_v54  ;;  %vm2643_vm14 = vcmask 261120  }
 0x122   :  { %v2642_v56 = vsel %vm2017_vm0, 4294967295, %v2641_v56  ;;  %v1334_v58 = vsel %vm2017_vm0, 1.0, %v1730_v54  ;;  %vm2644_vm0 = vmmov %vm2643_vm14 }
 0x123   :  { %vm2646_vm15 = vmmov %vm2644_vm0 }
 0x124   :  { %vm2648_vm1 = vmmov %vm2644_vm0 }
 0x125   :  { %vm2650_vm8 = vmmov %vm2644_vm0 }
 0x126   :  { %vm2651_vm11 = vmmov %vm2644_vm0 }
 0x127   :  { %vm2652_vm12 = vmmov %vm2644_vm0 }
 0x162   :  { %v2006_v46 = vpop.permute.xlu2 %1466 }
 0x163   :  { %v2605_v62 = vunpack.i.l.bf16 %v2006_v46 }
 0x16d   :  { %v2041_v8 = vpop.permute.xlu2 %1471 }
 0x16e   :  { %v2602_v54 = vunpack.i.h.bf16 %v2041_v8  ;;  %v2604_v19 = vunpack.i.l.bf16 %v2041_v8 }
 0x19c   :  { %v241_v5 = vpop.f32.mrf.mxu3 }
 0x19d   :  { %v1952_v6 = vadd.f32 %v241_v5, %v217_v18  ;;  %v1480_v5 = vpack.i.bf16 %v1333_v35, %v1334_v58 }
 0x19f   :  { %v325_v11 = vmul.f32 %v1449_v4, %v1952_v6  ;;  %v323_v28 = vmul.f32 %v1454_v21, %v1952_v6  ;;  %v321_v13 = vmul.f32 %v2608_v40, %v1952_v6 }
 0x1a1   :  { %435 = vrot.lane.b32.xlu0 %v325_v11, %s1732_s1 }
 0x1a4   :  { %v244_v24 = vpop.f32.mrf.mxu3 }
 0x1a5   :  { %v1965_v25 = vadd.f32 %v244_v24, %v217_v18  ;;  %v2607_v18 = vunpack.i.h.bf16 %v2024_v57 }
 0x1a7   :  { %v326_v33 = vmul.f32 %v1448_v20, %v1965_v25  ;;  %v324_v34 = vmul.f32 %v1453_v22, %v1965_v25  ;;  %v322_v53 = vmul.f32 %v2610_v43, %v1965_v25  ;;  %v318_v7 = vmul.f32 %v2605_v62, %v1965_v25 }
 0x1a8   :  { %v319_v11 = vmul.f32 %v2607_v18, %v1952_v6  ;;  %v320_v24 = vmul.f32 %v2609_v16, %v1965_v25 }
 0x1a9   :  { %431 = vrot.lane.b32.xlu0 %v323_v28, %s1732_s1  ;;  %437 = vrot.lane.b32.xlu2 %v326_v33, %s1732_s1  ;;  %v315_v28 = vmul.f32 %v2602_v54, %v1952_v6  ;;  %v316_v33 = vmul.f32 %v2604_v19, %v1965_v25 }
 0x1aa   :  { %433 = vrot.lane.b32.xlu1 %v324_v34, %s1732_s1  ;;  %v2606_v34 = vunpack.i.h.bf16 %v2006_v46 }
 0x1ac   :  { %v317_v38 = vmul.f32 %v2606_v34, %v1952_v6 }
 0x1b1   :  { %1476 = vrot.lane.b32.xlu2 %v2004_v44, %s1731_s0  ;;  %427 = vrot.lane.b32.xlu0 %v321_v13, %s1732_s1 }
 0x1b2   :  { %429 = vrot.lane.b32.xlu1 %v322_v53, %s1732_s1 }
 0x1b9   :  { %1481 = vrot.lane.b32.xlu2 %v1480_v5, %s1731_s0  ;;  %421 = vrot.lane.b32.xlu0 %v318_v7, %s1732_s1 }
 0x1ba   :  { %423 = vrot.lane.b32.xlu1 %v319_v11, %s1732_s1 }
 0x1c1   :  { %425 = vrot.lane.b32.xlu2 %v320_v24, %s1732_s1  ;;  %415 = vrot.lane.b32.xlu0 %v315_v28, %s1732_s1 }
 0x1c2   :  { %417 = vrot.lane.b32.xlu1 %v316_v33, %s1732_s1 }
 0x1c9   :  { %419 = vrot.lane.b32.xlu2 %v317_v38, %s1732_s1 }
 0x203   :  { %v438_v39 = vpop.permute.xlu2 %437 }
 0x204   :  { %1351 = vmatpush.xpose.msk.msra.mxu1 %vm2643_vm14, %v438_v39 }
 0x20b   :  { %v2070_v41 = vpop.permute.xlu2 %1476 }
 0x20c   :  { %v2595_v42 = vunpack.i.h.bf16 %v2070_v41  ;;  %v2603_v13 = vunpack.i.l.bf16 %v2070_v41 }
 0x20e   :  { %v313_v53 = vmul.f32 %v2595_v42, %v1952_v6  ;;  %v314_v35 = vmul.f32 %v2603_v13, %v1965_v25 }
 0x210   :  { %413 = vrot.lane.b32.xlu2 %v314_v35, %s1732_s1  ;;  %411 = vrot.lane.b32.xlu1 %v313_v53, %s1732_s1 }
 0x213   :  { %v2082_v58 = vpop.permute.xlu2 %1481  ;;  %v436_v7 = vpop.permute.xlu0 %435 }
 0x214   :  { %v2593_v11 = vunpack.i.h.bf16 %v2082_v58  ;;  %v2589_v24 = vunpack.i.l.bf16 %v2082_v58  ;;  %1352 = vmatpush.xpose.msk.msra.mxu1 %vm2643_vm14, %v436_v7  ;;  %vm2645_vm14 = vmmov %vm2644_vm0 }
 0x216   :  { %v311_v28 = vmul.f32 %v2593_v11, %v1952_v6  ;;  %v312_v33 = vmul.f32 %v2589_v24, %v1965_v25 }
 0x218   :  { %407 = vrot.lane.b32.xlu2 %v311_v28, %s1732_s1  ;;  %409 = vrot.lane.b32.xlu0 %v312_v33, %s1732_s1 }
 0x219   :  { %1486 = vrot.lane.b32.xlu1 %v1840_v59, %s1733_s21 }
 0x21b   :  { %v432_v39 = vpop.permute.xlu0 %431  ;;  %v426_v59 = vpop.permute.xlu2 %425 }
 0x21c   :  { %v434_v38 = vpop.permute.xlu1 %433 }
 0x21d   :  { %1353 = vmatpush.xpose.msk.msra.mxu1 %vm2644_vm0, %v434_v38 }
 0x220   :  { %1496 = vrot.lane.b32.xlu2 %v1853_v63, %s1733_s21  ;;  %1491 = vrot.lane.b32.xlu0 %v1893_v23, %s1733_s21 }
 0x221   :  { %1354 = vmatpush.xpose.msk.msra.mxu1 %vm2645_vm14, %v432_v39  ;;  %1501 = vrot.lane.b32.xlu1 %v1869_v9, %s1733_s21  ;;  %vm2647_vm14 = vmmov %vm2644_vm0 }
 0x223   :  { %v428_v35 = vpop.permute.xlu0 %427  ;;  %v420_v23 = vpop.permute.xlu2 %419 }
 0x224   :  { %v430_v53 = vpop.permute.xlu1 %429 }
 0x225   :  { %1355 = vmatpush.xpose.msk.msra.mxu1 %vm2646_vm15, %v430_v53  ;;  %vm2649_vm15 = vmmov %vm2644_vm0 }
 0x228   :  { %1511 = vrot.lane.b32.xlu2 %v1943_v60, %s1733_s21  ;;  %1506 = vrot.lane.b32.xlu0 %v1920_v45, %s1733_s21 }
 0x229   :  { %1516 = vrot.lane.b32.xlu1 %v2004_v44, %s1733_s21  ;;  %1356 = vmatpush.xpose.msk.msra.mxu1 %vm2644_vm0, %v428_v35 }
 0x22b   :  { %v422_v9 = vpop.permute.xlu0 %421 }
 0x22c   :  { %v424_v63 = vpop.permute.xlu1 %423 }
 0x22d   :  { %1357 = vmatpush.xpose.msk.msra.mxu1 %vm2647_vm14, %v426_v59  ;;  %vm2657_vm14 = vmmov %vm2644_vm0 }
 0x230   :  { %1521 = vrot.lane.b32.xlu0 %v1480_v5, %s1733_s21 }
 0x231   :  { %1358 = vmatpush.xpose.msk.msra.mxu1 %vm2648_vm1, %v424_v63  ;;  %vm2656_vm1 = vmmov %vm2644_vm0 }
 0x233   :  { %v416_v60 = vpop.permute.xlu0 %415 }
 0x234   :  { %v418_v45 = vpop.permute.xlu1 %417 }
 0x235   :  { %1359 = vmatpush.xpose.msk.msra.mxu1 %vm2649_vm15, %v422_v9  ;;  %vm2658_vm15 = vnez %v2628_v31 }
 0x239   :  { %1360 = vmatpush.xpose.msk.msra.mxu1 %vm2650_vm8, %v420_v23  ;;  %vm2654_vm8 = vmmov %vm2644_vm0 }
 0x23d   :  { %1361 = vmatpush.xpose.msk.msra.mxu1 %vm2651_vm11, %v418_v45  ;;  %vm2655_vm11 = vmmov %vm2644_vm0 }
 0x241   :  { %1362 = vmatpush.xpose.msk.msra.mxu1 %vm2652_vm12, %v416_v60  ;;  %vm2653_vm12 = vmmov %vm2644_vm0 }
 0x26a   :  { %v414_v44 = vpop.permute.xlu2 %413 }
 0x26b   :  { %1363 = vmatpush.xpose.msk.msra.mxu1 %vm2644_vm0, %v414_v44  ;;  %vm2659_vm0 = vnez %v2634_v52 }
 0x272   :  { %v408_v7 = vpop.permute.xlu2 %407 }
 0x27a   :  { %v2121_v28 = vpop.permute.xlu2 %1496 }
 0x27b   :  { %v2585_v5 = vunpack.i.h.bf16 %v2121_v28  ;;  %v2587_v33 = vunpack.i.l.bf16 %v2121_v28 }
 0x27d   :  { %v385_v38 = vmul.f32 %v2585_v5, %v1952_v6  ;;  %v386_v39 = vmul.f32 %v2587_v33, %v1965_v25 }
 0x27f   :  { %v1535_v53 = vpack.i.bf16 %v385_v38, %v386_v39 }
 0x281   :  { %1536 = vrot.lane.b32.xlu0 %v1535_v53, %s1733_s21 }
 0x282   :  { %v2132_v35 = vpop.permute.xlu2 %1511  ;;  %v412_v59 = vpop.permute.xlu1 %411 }
 0x283   :  { %v2583_v63 = vunpack.i.h.bf16 %v2132_v35  ;;  %v2584_v9 = vunpack.i.l.bf16 %v2132_v35  ;;  %1364 = vmatpush.xpose.msk.msra.mxu1 %vm2653_vm12, %v412_v59  ;;  %vm2660_vm12 = vnez %v2632_v47 }
 0x285   :  { %v379_v23 = vmul.f32 %v2583_v63, %v1952_v6  ;;  %v380_v45 = vmul.f32 %v2584_v9, %v1965_v25 }
 0x287   :  { %v1550_v60 = vpack.i.bf16 %v379_v23, %v380_v45 }
 0x289   :  { %1551 = vrot.lane.b32.xlu0 %v1550_v60, %s1733_s21 }
 0x28a   :  { %v410_v44 = vpop.permute.xlu0 %409 }
 0x28b   :  { %v2144_v38 = vpop.permute.xlu1 %1486  ;;  %1365 = vmatpush.xpose.msk.msra.mxu1 %vm2654_vm8, %v410_v44  ;;  %vm2661_vm8 = vnez %v2638_v27 }
 0x28c   :  { %v2586_v39 = vunpack.i.h.bf16 %v2144_v38  ;;  %v2588_v53 = vunpack.i.l.bf16 %v2144_v38 }
 0x28e   :  { %v389_v59 = vmul.f32 %v2586_v39, %v1952_v6  ;;  %v390_v63 = vmul.f32 %v2588_v53, %v1965_v25 }
 0x28f   :  { %1366 = vmatpush.xpose.msk.msra.mxu1 %vm2655_vm11, %v408_v7  ;;  %vm2662_vm11 = vnez %v2636_v26 }
 0x290   :  { %v1525_v23 = vpack.i.bf16 %v389_v59, %v390_v63 }
 0x292   :  { %1526 = vrot.lane.b32.xlu2 %v1525_v23, %s1733_s21  ;;  %v2157_v45 = vpop.permute.xlu0 %1491  ;;  %1367 = vmatmul.msk.f32.vlgmr.msra.gmra.mxu1 %vm2656_vm1, %v1952_v6  ;;  %vm2663_vm1 = vnez %v2642_v56 }
 0x293   :  { %v2590_v60 = vunpack.i.h.bf16 %v2157_v45  ;;  %v2591_v44 = vunpack.i.l.bf16 %v2157_v45  ;;  %v2163_v9 = vpop.permute.xlu1 %1501 }
 0x294   :  { %v2592_v5 = vunpack.i.h.bf16 %v2163_v9  ;;  %v2594_v39 = vunpack.i.l.bf16 %v2163_v9 }
 0x295   :  { %v387_v7 = vmul.f32 %v2590_v60, %v1952_v6  ;;  %v388_v63 = vmul.f32 %v2591_v44, %v1965_v25 }
 0x296   :  { %v383_v59 = vmul.f32 %v2592_v5, %v1952_v6  ;;  %v384_v23 = vmul.f32 %v2594_v39, %v1965_v25 }
 0x297   :  { %v1530_v33 = vpack.i.bf16 %v387_v7, %v388_v63 }
 0x298   :  { %v1540_v53 = vpack.i.bf16 %v383_v59, %v384_v23 }
 0x299   :  { %1531 = vrot.lane.b32.xlu1 %v1530_v33, %s1733_s21 }
 0x29a   :  { %1541 = vrot.lane.b32.xlu2 %v1540_v53, %s1733_s21  ;;  %v2181_v24 = vpop.permute.xlu0 %1506  ;;  %1368 = vmatmul.msk.f32.gmra.mxu1 %vm2657_vm14, %v1965_v25  ;;  %vm2664_vm14 = vnez %v2640_v55 }
 0x29b   :  { %v2596_v60 = vunpack.i.h.bf16 %v2181_v24  ;;  %v2597_v44 = vunpack.i.l.bf16 %v2181_v24  ;;  %v2187_v5 = vpop.permute.xlu1 %1516 }
 0x29c   :  { %v2598_v11 = vunpack.i.h.bf16 %v2187_v5  ;;  %v2599_v7 = vunpack.i.l.bf16 %v2187_v5 }
 0x29d   :  { %v381_v33 = vmul.f32 %v2596_v60, %v1952_v6  ;;  %v382_v53 = vmul.f32 %v2597_v44, %v1965_v25 }
 0x29e   :  { %v377_v63 = vmul.f32 %v2598_v11, %v1952_v6  ;;  %v378_v59 = vmul.f32 %v2599_v7, %v1965_v25 }
 0x29f   :  { %v1545_v23 = vpack.i.bf16 %v381_v33, %v382_v53  ;;  %v1734_v53 = vmov 1.0  }
 0x2a0   :  { %v1555_v39 = vpack.i.bf16 %v377_v63, %v378_v59  ;;  %1369 = vmatpush.msk.msrb.mxu3 %vm1814_vm3, %v1734_v53 }
 0x2a1   :  { %1546 = vrot.lane.b32.xlu1 %v1545_v23, %s1733_s21 }
 0x2a2   :  { %1556 = vrot.lane.b32.xlu2 %v1555_v39, %s1733_s21  ;;  %v2205_v42 = vpop.permute.xlu0 %1521  ;;  %1370 = vmatpush.msk.msrb.mxu3 %vm1809_vm2, %v1734_v53  ;;  %v130_v39 = vand.u32 15, %v1794_v30 }
 0x2a3   :  { %v2600_v60 = vunpack.i.h.bf16 %v2205_v42  ;;  %v2601_v44 = vunpack.i.l.bf16 %v2205_v42 }
 0x2a4   :  { %1371 = vmatpush.msk.msrb.mxu3 %vm1878_vm10, %v1734_v53  ;;  %v133_v63 = vshra.s32 %v130_v39, 3 }
 0x2a5   :  { %v375_v11 = vmul.f32 %v2600_v60, %v1952_v6  ;;  %v376_v7 = vmul.f32 %v2601_v44, %v1965_v25  ;;  %v132_v60 = vshra.s32 %v1987_v36, 3 }
 0x2a6   :  { %1372 = vmatpush.msk.msrb.mxu3 %vm1873_vm9, %v1734_v53 }
 0x2a7   :  { %v1560_v33 = vpack.i.bf16 %v375_v11, %v376_v7  ;;  %v131_v7 = vshra.s32 %v1791_v29, 3 }
 0x2a8   :  { %1373 = vmatpush.msk.msrb.mxu3 %vm1824_vm5, %v1734_v53 }
 0x2a9   :  { %1561 = vrot.lane.b32.xlu1 %v1560_v33, %s1733_s21 }
 0x2aa   :  { %1374 = vmatpush.msk.msrb.mxu3 %vm1819_vm4, %v1734_v53 }
 0x2ac   :  { %1375 = vmatpush.msk.msrb.mxu3 %vm1856_vm7, %v1734_v53 }
 0x2ae   :  { %1376 = vmatpush.msk.msrb.mxu3 %vm1847_vm6, %v1734_v53 }
 0x2b0   :  { %1377 = vmatpush.msk.msrb.mxu3 %vm1904_vm13, %v1734_v53 }
 0x2b2   :  { %1378 = vmatpush.msk.msrb.mxu3 %vm2658_vm15, %v1734_v53  ;;  %vm2670_vm15 = vcmask 261120  }
 0x2b4   :  { %1379 = vmatpush.msk.msrb.mxu3 %vm2659_vm0, %v1734_v53 }
 0x2b6   :  { %1380 = vmatpush.msk.msrb.mxu3 %vm2660_vm12, %v1734_v53  ;;  %vm134_vm12 = vcmp.eq.s32.totalorder %v131_v7, %v133_v63 }
 0x2b8   :  { %1381 = vmatpush.msk.msrb.mxu3 %vm2661_vm8, %v1734_v53 }
 0x2ba   :  { %1382 = vmatpush.msk.msrb.mxu3 %vm2662_vm11, %v1734_v53 }
 0x2bc   :  { %1383 = vmatpush.msk.msrb.mxu3 %vm2663_vm1, %v1734_v53 }
 0x2be   :  { %1384 = vmatpush.msk.msrb.mxu3 %vm2664_vm14, %v1734_v53  ;;  %vm135_vm14 = vcmp.eq.s32.totalorder %v132_v60, %v133_v63 }
 0x2ec   :  { %v1527_v6 = vpop.permute.xlu2 %1526 }
 0x2ed   :  { %v1528_v25 = vunpack.i.l.bf16 %v1527_v6  ;;  %v1529_v11 = vunpack.i.h.bf16 %v1527_v6  ;;  %v1735_v6 = vmov -1e+30  }
 0x2ee   :  { %v2270_v62 = vsel %vm135_vm14, 0.0, %v1735_v6 }
 0x2ef   :  { %568 = vmatpush.msra.mxu2 %v1528_v25  ;;  %v2266_v25 = vsel %vm134_vm12, 0.0, %v1735_v6  ;;  %vm2665_vm12 = vcmask 261120  }
 0x2f0   :  { %vm2666_vm14 = vmmov %vm2665_vm12 }
 0x2f1   :  { %569 = vmatpush.msra.mxu2 %v1529_v11  ;;  %vm2667_vm1 = vmmov %vm2665_vm12 }
 0x2f3   :  { %v1537_v33 = vpop.permute.xlu0 %1536 }
 0x2f4   :  { %v1538_v13 = vunpack.i.l.bf16 %v1537_v33  ;;  %v1542_v30 = vpop.permute.xlu2 %1541  ;;  %v1539_v29 = vunpack.i.h.bf16 %v1537_v33 }
 0x2f5   :  { %v1543_v39 = vunpack.i.l.bf16 %v1542_v30 }
 0x30b   :  { %v1532_v59 = vpop.permute.xlu1 %1531 }
 0x30c   :  { %v1533_v23 = vunpack.i.l.bf16 %v1532_v59  ;;  %v1534_v11 = vunpack.i.h.bf16 %v1532_v59  ;;  %v1544_v59 = vunpack.i.h.bf16 %v1542_v30 }
 0x30e   :  { %570 = vmatpush.msra.mxu2 %v1533_v23 }
 0x30f   :  { %v494_v44 = vpop.f32.mrf.mxu1 }
 0x310   :  { %v495_v54 = vadd.f32 %v494_v44, %v2266_v25  ;;  %571 = vmatpush.msra.mxu2 %v1534_v11  ;;  %v1552_v11 = vpop.permute.xlu0 %1551 }
 0x311   :  { %v1554_v60 = vunpack.i.h.bf16 %v1552_v11 }
 0x312   :  { %v500_v19 = vmul.f32 1.442695, %v495_v54  ;;  %572 = vmatpush.msra.mxu2 %v1538_v13  ;;  %v1557_v13 = vpop.permute.xlu2 %1556 }
 0x313   :  { %v1547_v7 = vpop.permute.xlu1 %1546  ;;  %v1558_v63 = vunpack.i.l.bf16 %v1557_v13  ;;  %v1559_v30 = vunpack.i.h.bf16 %v1557_v13 }
 0x314   :  { %1611 = vpow2.f32 %v500_v19  ;;  %573 = vmatpush.msra.mxu2 %v1539_v29  ;;  %v1548_v44 = vunpack.i.l.bf16 %v1547_v7  ;;  %v1549_v54 = vunpack.i.h.bf16 %v1547_v7  ;;  %v1553_v19 = vunpack.i.l.bf16 %v1552_v11  ;;  %v144_v7 = vld [vmem:[#allocation5 + $0x30] sm:$0xff] }
 0x316   :  { %574 = vmatpush.msra.mxu2 %v1543_v39 }
 0x317   :  { %v497_v23 = vpop.f32.mrf.mxu1 }
 0x318   :  { %v498_v36 = vadd.f32 %v497_v23, %v2270_v62  ;;  %575 = vmatpush.msra.mxu2 %v1544_v59  ;;  %v143_v59 = vld [vmem:[#allocation5 + $0x28] sm:$0xff]  ;;  %v142_v23 = vld [vmem:[#allocation5 + $0x20] sm:$0xff] }
 0x31a   :  { %v1612_v34 = vpop.eup %1611  ;;  %v502_v18 = vmul.f32 1.442695, %v498_v36  ;;  %576 = vmatpush.msra.mxu2 %v1548_v44 }
 0x31b   :  { %607 = vmatmul.f32.vlgmr.msrb.gmra.mxu3 %v1612_v34  ;;  %v1562_v33 = vpop.permute.xlu1 %1561 }
 0x31c   :  { %1613 = vpow2.f32 %v502_v18  ;;  %577 = vmatpush.msra.mxu2 %v1549_v54  ;;  %v1563_v29 = vunpack.i.l.bf16 %v1562_v33  ;;  %v1564_v39 = vunpack.i.h.bf16 %v1562_v33  ;;  %v145_v18 = vld [vmem:[#allocation5 + $0x38] sm:$0xff] }
 0x31d   :  { %636 = vmatpush.msra.mxu0 %v145_v18 }
 0x31e   :  { %578 = vmatpush.msra.mxu2 %v1553_v19 }
 0x31f   :  { %637 = vmatpush.msra.mxu0 %v144_v7 }
 0x320   :  { %579 = vmatpush.msra.mxu2 %v1554_v60 }
 0x321   :  { %638 = vmatpush.msra.mxu0 %v143_v59 }
 0x322   :  { %v1614_v6 = vpop.eup %1613  ;;  %580 = vmatpush.msra.mxu2 %v1558_v63  ;;  %v649_v63 = vperm.slane %v1882_v17, 3 }
 0x323   :  { %610 = vmatmul.f32.gmra.mxu3 %v1614_v6  ;;  %639 = vmatpush.msra.mxu0 %v142_v23 }
 0x324   :  { %581 = vmatpush.msra.mxu2 %v1559_v30 }
 0x326   :  { %582 = vmatpush.msra.mxu2 %v1563_v29 }
 0x328   :  { %583 = vmatpush.msra.mxu2 %v1564_v39 }
 0x329   :  { %584 = vmatmul.f32.vlgmr.msra.gmra.mxu2 %v1612_v34 }
 0x331   :  { %587 = vmatmul.f32.gmra.mxu2 %v1614_v6 }
 0x39e   :  { %v608_v36 = vpop.f32.mrf.mxu3 }
 0x39f   :  { %1615 = vrcp.f32 %v608_v36 }
 0x3a5   :  { %v1616_v11 = vpop.eup %1615 }
 0x3a6   :  { %v611_v44 = vpop.f32.mrf.mxu3 }
 0x3a7   :  { %1617 = vrcp.f32 %v611_v44 }
 0x3ac   :  { %v585_v54 = vpop.f32.mrf.mxu2 }
 0x3ad   :  { %v616_v19 = vmul.f32 %v1616_v11, %v585_v54  ;;  %v1618_v13 = vpop.eup %1617 }
 0x3af   :  { %1385 = vmatmul.msk.f32.vlgmr.msra.gmra.mxu0 %vm2665_vm12, %v616_v19  ;;  %vm2668_vm12 = vmmov %vm2667_vm1 }
 0x3b4   :  { %v588_v34 = vpop.f32.mrf.mxu2 }
 0x3b5   :  { %v617_v60 = vmul.f32 %v1618_v13, %v588_v34 }
 0x3b7   :  { %1386 = vmatmul.msk.f32.gmra.mxu0 %vm2666_vm14, %v617_v60  ;;  %vm2669_vm14 = vmmov %vm2667_vm1  ;;  %v149_v60 = vld [vmem:[#allocation5 + $0x58] sm:$0xff] }
 0x3b8   :  { %721 = vmatpush.msrb.mxu0 %v149_v60 }
 0x42c   :  { %v641_v33 = vpop.f32.mrf.mxu0 }
 0x42d   :  { %v647_v6 = vadd.f32 %v641_v33, %v1764_v0  ;;  %v147_v33 = vld [vmem:[#allocation5 + $0x48] sm:$0xff] }
 0x42f   :  { %v2277_v30 = vadd.f32 %v649_v63, %v647_v6  ;;  %v146_v6 = vld [vmem:[#allocation5 + $0x40] sm:$0xff] }
 0x431   :  { %v652_v29 = vsel %vm2667_vm1, %v2277_v30, 0.0 }
 0x432   :  { %653 = vadd.xlane.f32.xlu0 %v652_v29 }
 0x434   :  { %v644_v39 = vpop.f32.mrf.mxu0 }
 0x435   :  { %v648_v18 = vadd.f32 %v644_v39, %v1768_v2 }
 0x437   :  { %v2282_v7 = vadd.f32 %v649_v63, %v648_v18  ;;  %v148_v63 = vld [vmem:[#allocation5 + $0x50] sm:$0xff] }
 0x438   :  { %722 = vmatpush.msrb.mxu0 %v148_v63 }
 0x439   :  { %v655_v59 = vsel %vm2668_vm12, %v2282_v7, 0.0 }
 0x43a   :  { %656 = vadd.xlane.f32.xlu2 %v655_v59  ;;  %723 = vmatpush.msrb.mxu0 %v147_v33  ;;  %v696_v33 = vperm.slane %v1882_v17, 4 }
 0x43c   :  { %724 = vmatpush.msrb.mxu0 %v146_v6 }
 0x4a5   :  { %v654_v23 = vpop.xlane.xlu0 %653 }
 0x4a6   :  { %v658_v36 = vmul.f32 %v654_v23, %v1772_v10 }
 0x4a8   :  { %v660_v0 = vsub.f32 %v2277_v30, %v658_v36 }
 0x4aa   :  { %v662_v44 = vmul.f32 %v660_v0, %v660_v0 }
 0x4ac   :  { %v664_v11 = vsel %vm2669_vm14, %v662_v44, 0.0 }
 0x4ad   :  { %665 = vadd.xlane.f32.xlu1 %v664_v11  ;;  %v657_v54 = vpop.xlane.xlu2 %656 }
 0x4ae   :  { %v659_v19 = vmul.f32 %v657_v54, %v1772_v10 }
 0x4b0   :  { %v661_v2 = vsub.f32 %v2282_v7, %v659_v19 }
 0x4b2   :  { %v663_v13 = vmul.f32 %v661_v2, %v661_v2 }
 0x4b4   :  { %v667_v34 = vsel %vm2667_vm1, %v663_v13, 0.0 }
 0x4b5   :  { %668 = vadd.xlane.f32.xlu0 %v667_v34 }
 0x520   :  { %v666_v29 = vpop.xlane.xlu1 %665 }
 0x521   :  { %v670_v39 = vmul.f32 %v666_v29, %v1772_v10 }
 0x523   :  { %v672_v18 = vadd.f32 1e-05, %v670_v39 }
 0x525   :  { %1619 = vrsqrt.f32 %v672_v18  ;;  %vm680_vm14 = vweird.f32 %v672_v18 }
 0x528   :  { %v669_v59 = vpop.xlane.xlu0 %668 }
 0x529   :  { %v671_v23 = vmul.f32 %v669_v59, %v1772_v10  ;;  %v699_v59 = vperm.slane %v1882_v17, 5 }
 0x52b   :  { %v1620_v36 = vpop.eup %1619  ;;  %v673_v44 = vadd.f32 1e-05, %v671_v23 }
 0x52c   :  { %v675_v11 = vmul.f32 %v1620_v36, %v672_v18  ;;  %vm681_vm12 = vweird.f32 %v1620_v36 }
 0x52d   :  { %1621 = vrsqrt.f32 %v673_v44  ;;  %vm682_vm1 = vmor %vm680_vm14, %vm681_vm12  ;;  %vm690_vm8 = vweird.f32 %v673_v44 }
 0x52e   :  { %v676_v54 = vmul.f32 %v1620_v36, %v675_v11  ;;  %vm2671_vm12 = vmmov %vm2670_vm15 }
 0x530   :  { %v677_v19 = vmul.f32 0.5, %v676_v54 }
 0x532   :  { %v678_v13 = vsub.f32 1.5, %v677_v19 }
 0x533   :  { %v1622_v34 = vpop.eup %1621 }
 0x534   :  { %v679_v60 = vmul.f32 %v1620_v36, %v678_v13  ;;  %v685_v63 = vmul.f32 %v1622_v34, %v673_v44  ;;  %vm691_vm11 = vweird.f32 %v1622_v34  ;;  %v151_v44 = vld [vmem:[#allocation5 + $0x68] sm:$0xff] }
 0x535   :  { %vm692_vm0 = vmor %vm690_vm8, %vm691_vm11 }
 0x536   :  { %v683_v6 = vsel %vm682_vm1, %v1620_v36, %v679_v60  ;;  %v686_v29 = vmul.f32 %v1622_v34, %v685_v63  ;;  %v157_v36 = vld [vmem:[#allocation5 + $0x98] sm:$0xff]  ;;  %v155_v60 = vld [vmem:[#allocation5 + $0x88] sm:$0xff]  ;;  %vm2681_vm1 = vnez %v2642_v56  ;;  %v856_v56 = vperm.slane %v2354_v1, 2 }
 0x537   :  { %v694_v39 = vmul.f32 %v683_v6, %v660_v0  ;;  %765 = vmatpush.msrb.mxu2 %v157_v36  ;;  %v156_v0 = vld [vmem:[#allocation5 + $0x90] sm:$0xff]  ;;  %v153_v63 = vld [vmem:[#allocation5 + $0x78] sm:$0xff]  ;;  %v150_v6 = vld [vmem:[#allocation5 + $0x60] sm:$0xff] }
 0x538   :  { %v687_v40 = vmul.f32 0.5, %v686_v29 }
 0x539   :  { %v697_v23 = vmul.f32 %v696_v33, %v694_v39  ;;  %766 = vmatpush.msrb.mxu2 %v156_v0 }
 0x53a   :  { %v688_v16 = vsub.f32 1.5, %v687_v40  ;;  %v154_v40 = vld [vmem:[#allocation5 + $0x80] sm:$0xff] }
 0x53b   :  { %v700_v11 = vadd.f32 %v699_v59, %v697_v23  ;;  %767 = vmatpush.msrb.mxu2 %v155_v60 }
 0x53c   :  { %v689_v54 = vmul.f32 %v1622_v34, %v688_v16  ;;  %v152_v16 = vld [vmem:[#allocation5 + $0x70] sm:$0xff] }
 0x53d   :  { %1387 = vmatmul.msk.f32.vlgmr.msrb.gmra.mxu0 %vm2670_vm15, %v700_v11  ;;  %768 = vmatpush.msrb.mxu2 %v154_v40  ;;  %vm750_vm15 = vcmask 523264  }
 0x53e   :  { %v693_v18 = vsel %vm692_vm0, %v1622_v34, %v689_v54  ;;  %vm2672_vm0 = vmmov %vm2671_vm12 }
 0x53f   :  { %v695_v19 = vmul.f32 %v693_v18, %v661_v2  ;;  %769 = vmatpush.msrb.mxu2 %v153_v63  ;;  %v702_v2 = vperm.slane %v1882_v17, 6  ;;  %vm2673_vm8 = vmmov %vm2672_vm0 }
 0x540   :  { %vm2674_vm11 = vmmov %vm2672_vm0 }
 0x541   :  { %v698_v13 = vmul.f32 %v696_v33, %v695_v19  ;;  %770 = vmatpush.msrb.mxu2 %v152_v16  ;;  %vm2675_vm14 = vmmov %vm2672_vm0 }
 0x543   :  { %v701_v43 = vadd.f32 %v699_v59, %v698_v13  ;;  %771 = vmatpush.msrb.mxu2 %v151_v44 }
 0x545   :  { %1388 = vmatmul.msk.f32.gmra.mxu0 %vm2671_vm12, %v701_v43  ;;  %772 = vmatpush.msrb.mxu2 %v150_v6 }
 0x5ba   :  { %v726_v34 = vpop.f32.mrf.mxu0 }
 0x5bb   :  { %v727_v43 = vadd.f32 %v726_v34, %v702_v2 }
 0x5bd   :  { %v732_v33 = vmul.f32 %v727_v43, %v727_v43 }
 0x5bf   :  { %v734_v29 = vmul.f32 %v732_v33, %v727_v43 }
 0x5c1   :  { %v736_v39 = vmul.f32 0.044715, %v734_v29 }
 0x5c2   :  { %v729_v59 = vpop.f32.mrf.mxu0 }
 0x5c3   :  { %v738_v23 = vadd.f32 %v736_v39, %v727_v43  ;;  %v730_v11 = vadd.f32 %v729_v59, %v702_v2  ;;  %v782_v2 = vperm.slane %v1882_v17, 7 }
 0x5c5   :  { %v740_v54 = vmul.f32 0.7978846, %v738_v23  ;;  %v733_v18 = vmul.f32 %v730_v11, %v730_v11 }
 0x5c7   :  { %1623 = vtanh.f32 %v740_v54  ;;  %v735_v19 = vmul.f32 %v733_v18, %v730_v11 }
 0x5c9   :  { %v737_v13 = vmul.f32 0.044715, %v735_v19 }
 0x5cb   :  { %v739_v36 = vadd.f32 %v737_v13, %v730_v11 }
 0x5cd   :  { %v1624_v0 = vpop.eup %1623  ;;  %v741_v60 = vmul.f32 0.7978846, %v739_v36 }
 0x5ce   :  { %v744_v40 = vadd.f32 1.0, %v1624_v0 }
 0x5cf   :  { %1625 = vtanh.f32 %v741_v60 }
 0x5d0   :  { %v746_v63 = vmul.f32 0.5, %v744_v40 }
 0x5d2   :  { %v748_v16 = vmul.f32 %v746_v63, %v727_v43 }
 0x5d4   :  { %1389 = vmatmul.msk.f32.vlgmr.msrb.gmra.mxu2 %vm750_vm15, %v748_v16  ;;  %v788_v16 = vld [vmem:[#allocation5 + $0xc0] sm:$0xff] }
 0x5d5   :  { %v1626_v44 = vpop.eup %1625  ;;  %875 = vmatpush.msra.mxu3 %v788_v16 }
 0x5d6   :  { %v745_v6 = vadd.f32 1.0, %v1626_v44  ;;  %v787_v44 = vld [vmem:[#allocation5 + $0xb8] sm:$0xff] }
 0x5d7   :  { %876 = vmatpush.msra.mxu3 %v787_v44 }
 0x5d8   :  { %v747_v34 = vmul.f32 0.5, %v745_v6  ;;  %v786_v6 = vld [vmem:[#allocation5 + $0xb0] sm:$0xff] }
 0x5d9   :  { %877 = vmatpush.msra.mxu3 %v786_v6 }
 0x5da   :  { %v749_v33 = vmul.f32 %v747_v34, %v730_v11  ;;  %v785_v34 = vld [vmem:[#allocation5 + $0xa8] sm:$0xff] }
 0x5db   :  { %878 = vmatpush.msra.mxu3 %v785_v34 }
 0x5dc   :  { %1390 = vmatmul.msk.f32.gmra.mxu2 %vm750_vm15, %v749_v33 }
 0x5dd   :  { %1411 = vmatpush.msk.msrb.mxu3 %vm1814_vm3, %v1734_v53 }
 0x5df   :  { %1412 = vmatpush.msk.msrb.mxu3 %vm1809_vm2, %v1734_v53  ;;  %vm2676_vm2 = vnez %v2628_v31 }
 0x5e1   :  { %1413 = vmatpush.msk.msrb.mxu3 %vm1878_vm10, %v1734_v53  ;;  %vm2680_vm10 = vnez %v2636_v26 }
 0x5e3   :  { %1414 = vmatpush.msk.msrb.mxu3 %vm1873_vm9, %v1734_v53  ;;  %vm2679_vm9 = vnez %v2638_v27 }
 0x5e5   :  { %1415 = vmatpush.msk.msrb.mxu3 %vm1824_vm5, %v1734_v53 }
 0x5e7   :  { %1416 = vmatpush.msk.msrb.mxu3 %vm1819_vm4, %v1734_v53  ;;  %vm2677_vm4 = vnez %v2634_v52  ;;  %v853_v52 = vperm.slane %v2354_v1, 1 }
 0x5e9   :  { %1417 = vmatpush.msk.msrb.mxu3 %vm1856_vm7, %v1734_v53 }
 0x5eb   :  { %1418 = vmatpush.msk.msrb.mxu3 %vm1847_vm6, %v1734_v53  ;;  %vm2678_vm6 = vnez %v2632_v47 }
 0x5ed   :  { %1419 = vmatpush.msk.msrb.mxu3 %vm1904_vm13, %v1734_v53 }
 0x5ef   :  { %1420 = vmatpush.msk.msrb.mxu3 %vm2676_vm2, %v1734_v53  ;;  %vm2712_vm2 = vmmov %vm2674_vm11 }
 0x5f1   :  { %1421 = vmatpush.msk.msrb.mxu3 %vm2677_vm4, %v1734_v53  ;;  %vm2714_vm4 = vmmov %vm2712_vm2 }
 0x5f3   :  { %1422 = vmatpush.msk.msrb.mxu3 %vm2678_vm6, %v1734_v53  ;;  %vm2716_vm6 = vmmov %vm2712_vm2 }
 0x5f5   :  { %1423 = vmatpush.msk.msrb.mxu3 %vm2679_vm9, %v1734_v53  ;;  %vm2718_vm9 = vmmov %vm2712_vm2 }
 0x5f7   :  { %1424 = vmatpush.msk.msrb.mxu3 %vm2680_vm10, %v1734_v53  ;;  %vm2719_vm10 = vmmov %vm2712_vm2 }
 0x5f9   :  { %1425 = vmatpush.msk.msrb.mxu3 %vm2681_vm1, %v1734_v53  ;;  %vm2721_vm1 = vmmov %vm2712_vm2 }
 0x657   :  { %v774_v29 = vpop.f32.mrf.mxu2 }
 0x658   :  { %v780_v39 = vadd.f32 %v774_v29, %v2277_v30 }
 0x65a   :  { %v2303_v59 = vadd.f32 %v782_v2, %v780_v39 }
 0x65c   :  { %v806_v23 = vsel %vm2672_vm0, %v2303_v59, 0.0  ;;  %vm2682_vm0 = vnez %v2640_v55 }
 0x65d   :  { %807 = vadd.xlane.f32.xlu2 %v806_v23  ;;  %1426 = vmatpush.msk.msrb.mxu3 %vm2682_vm0, %v1734_v53  ;;  %vm2723_vm0 = vmmov %vm2721_vm1 }
 0x65f   :  { %v777_v43 = vpop.f32.mrf.mxu2 }
 0x660   :  { %v781_v54 = vadd.f32 %v777_v43, %v2282_v7 }
 0x662   :  { %v2308_v18 = vadd.f32 %v782_v2, %v781_v54 }
 0x664   :  { %v809_v11 = vsel %vm2673_vm8, %v2308_v18, 0.0 }
 0x665   :  { %810 = vadd.xlane.f32.xlu1 %v809_v11 }
 0x6d0   :  { %v808_v19 = vpop.xlane.xlu2 %807 }
 0x6d1   :  { %v812_v17 = vmul.f32 %v808_v19, %v1772_v10 }
 0x6d3   :  { %v814_v30 = vsub.f32 %v2303_v59, %v812_v17 }
 0x6d5   :  { %v816_v13 = vmul.f32 %v814_v30, %v814_v30 }
 0x6d7   :  { %v818_v36 = vsel %vm2674_vm11, %v816_v13, 0.0 }
 0x6d8   :  { %v811_v0 = vpop.xlane.xlu1 %810  ;;  %819 = vadd.xlane.f32.xlu0 %v818_v36 }
 0x6d9   :  { %v813_v60 = vmul.f32 %v811_v0, %v1772_v10 }
 0x6db   :  { %v2317_v7 = vsub.f32 %v2308_v18, %v813_v60 }
 0x6dd   :  { %v817_v40 = vmul.f32 %v2317_v7, %v2317_v7 }
 0x6df   :  { %v821_v63 = vsel %vm2675_vm14, %v817_v40, 0.0  ;;  %vm2683_vm14 = vmmov %vm2674_vm11 }
 0x6e0   :  { %822 = vadd.xlane.f32.xlu2 %v821_v63 }
 0x74b   :  { %v820_v33 = vpop.xlane.xlu0 %819 }
 0x74c   :  { %v824_v2 = vmul.f32 %v820_v33, %v1772_v10 }
 0x74e   :  { %v826_v29 = vadd.f32 1e-05, %v824_v2  ;;  %v2688_v2 = vunpack.i.h.bf16 %v2006_v46 }
 0x750   :  { %1627 = vrsqrt.f32 %v826_v29  ;;  %vm834_vm5 = vweird.f32 %v826_v29 }
 0x753   :  { %v823_v49 = vpop.xlane.xlu2 %822 }
 0x754   :  { %v825_v48 = vmul.f32 %v823_v49, %v1772_v10  ;;  %v2689_v49 = vunpack.i.l.bf16 %v2006_v46  ;;  %v2693_v46 = vunpack.i.h.bf16 %v2070_v41 }
 0x756   :  { %v1628_v14 = vpop.eup %1627  ;;  %v827_v39 = vadd.f32 1e-05, %v825_v48 }
 0x757   :  { %v829_v12 = vmul.f32 %v1628_v14, %v826_v29  ;;  %vm835_vm3 = vweird.f32 %v1628_v14 }
 0x758   :  { %1629 = vrsqrt.f32 %v827_v39  ;;  %vm836_vm7 = vmor %vm834_vm5, %vm835_vm3  ;;  %vm844_vm12 = vweird.f32 %v827_v39 }
 0x759   :  { %v830_v51 = vmul.f32 %v1628_v14, %v829_v12  ;;  %v2692_v12 = vunpack.i.h.bf16 %v2041_v8  ;;  %vm2713_vm3 = vmmov %vm2712_vm2 }
 0x75a   :  { %vm2715_vm5 = vmmov %vm2712_vm2 }
 0x75b   :  { %v831_v50 = vmul.f32 0.5, %v830_v51 }
 0x75d   :  { %v832_v23 = vsub.f32 1.5, %v831_v50 }
 0x75e   :  { %v1630_v61 = vpop.eup %1629 }
 0x75f   :  { %v833_v43 = vmul.f32 %v1628_v14, %v832_v23  ;;  %v839_v54 = vmul.f32 %v1630_v61, %v827_v39  ;;  %vm845_vm13 = vweird.f32 %v1630_v61  ;;  %v2694_v23 = vunpack.i.h.bf16 %v2082_v58 }
 0x760   :  { %vm846_vm8 = vmor %vm844_vm12, %vm845_vm13 }
 0x761   :  { %v837_v31 = vsel %vm836_vm7, %v1628_v14, %v833_v43  ;;  %v840_v11 = vmul.f32 %v1630_v61, %v839_v54  ;;  %v2695_v43 = vunpack.i.l.bf16 %v2082_v58  ;;  %v2699_v58 = vunpack.i.h.bf16 %v2144_v38  ;;  %vm2717_vm7 = vmmov %vm2712_vm2 }
 0x762   :  { %v848_v19 = vmul.f32 %v837_v31, %v814_v30  ;;  %vm2720_vm13 = vmmov %vm2712_vm2 }
 0x763   :  { %v841_v17 = vmul.f32 0.5, %v840_v11  ;;  %v2698_v11 = vunpack.i.l.bf16 %v2157_v45  ;;  %vm2722_vm12 = vmmov %vm2721_vm1 }
 0x764   :  { %v851_v13 = vmul.f32 %v850_v32, %v848_v19 }
 0x765   :  { %v842_v47 = vsub.f32 1.5, %v841_v17  ;;  %v2700_v17 = vunpack.i.h.bf16 %v2121_v28 }
 0x766   :  { %v854_v36 = vadd.f32 %v853_v52, %v851_v13 }
 0x767   :  { %v843_v0 = vmul.f32 %v1630_v61, %v842_v47  ;;  %v2701_v47 = vunpack.i.h.bf16 %v2157_v45  ;;  %v2704_v45 = vunpack.i.l.bf16 %v2181_v24 }
 0x768   :  { %1391 = vmatmul.msk.f32.vlgmr.msra.gmra.mxu3 %vm2674_vm11, %v854_v36  ;;  %vm2725_vm11 = vmmov %vm2723_vm0 }
 0x769   :  { %v847_v27 = vsel %vm846_vm8, %v1630_v61, %v843_v0  ;;  %vm2724_vm8 = vmmov %vm2723_vm0 }
 0x76a   :  { %v849_v26 = vmul.f32 %v847_v27, %v2317_v7 }
 0x76c   :  { %v852_v30 = vmul.f32 %v850_v32, %v849_v26 }
 0x76e   :  { %v855_v60 = vadd.f32 %v853_v52, %v852_v30 }
 0x770   :  { %1392 = vmatmul.msk.f32.gmra.mxu3 %vm2683_vm14, %v855_v60  ;;  %vm2726_vm14 = vmmov %vm2723_vm0 }
 0x7eb   :  { %v880_v40 = vpop.f32.mrf.mxu3 }
 0x7ec   :  { %v2380_v63 = vadd.f32 %v880_v40, %v856_v56  ;;  %v2705_v40 = vunpack.i.h.bf16 %v2163_v9 }
 0x7ee   :  { %v900_v55 = vmul.f32 %v1449_v4, %v2380_v63  ;;  %v898_v7 = vmul.f32 %v1454_v21, %v2380_v63  ;;  %v2684_v4 = vunpack.i.l.bf16 %v1989_v37  ;;  %v2685_v21 = vunpack.i.l.bf16 %v2024_v57 }
 0x7ef   :  { %v892_v29 = vmul.f32 %v2688_v2, %v2380_v63  ;;  %v2690_v37 = vunpack.i.l.bf16 %v2041_v8  ;;  %v2691_v57 = vunpack.i.l.bf16 %v2070_v41  ;;  %v890_v51 = vmul.f32 %v2692_v12, %v2380_v63 }
 0x7f0   :  { %962 = vrot.lane.b32.xlu0 %v900_v55, %s1732_s1  ;;  %v888_v50 = vmul.f32 %v2693_v46, %v2380_v63  ;;  %v886_v61 = vmul.f32 %v2694_v23, %v2380_v63  ;;  %v2696_v8 = vunpack.i.l.bf16 %v2144_v38  ;;  %v2697_v41 = vunpack.i.l.bf16 %v2121_v28 }
 0x7f1   :  { %v916_v52 = vmul.f32 %v2699_v58, %v2380_v63  ;;  %v912_v13 = vmul.f32 %v2700_v17, %v2380_v63  ;;  %v914_v36 = vmul.f32 %v2701_v47, %v2380_v63  ;;  %v2702_v38 = vunpack.i.l.bf16 %v2163_v9 }
 0x7f2   :  { %v2703_v28 = vunpack.i.l.bf16 %v2132_v35  ;;  %v910_v55 = vmul.f32 %v2705_v40, %v2380_v63  ;;  %v2708_v9 = vunpack.i.l.bf16 %v2187_v5 }
 0x7f3   :  { %v883_v53 = vpop.f32.mrf.mxu3 }
 0x7f4   :  { %v2386_v16 = vadd.f32 %v883_v53, %v856_v56  ;;  %v2706_v53 = vunpack.i.h.bf16 %v2132_v35  ;;  %v2709_v35 = vunpack.i.l.bf16 %v2205_v42 }
 0x7f6   :  { %v901_v44 = vmul.f32 %v1448_v20, %v2386_v16  ;;  %v899_v6 = vmul.f32 %v1453_v22, %v2386_v16  ;;  %v897_v34 = vmul.f32 %v2684_v4, %v2386_v16  ;;  %v895_v33 = vmul.f32 %v2685_v21, %v2386_v16 }
 0x7f7   :  { %v896_v20 = vmul.f32 %v2686_v3, %v2380_v63  ;;  %v894_v22 = vmul.f32 %v2687_v15, %v2380_v63  ;;  %v893_v48 = vmul.f32 %v2689_v49, %v2386_v16  ;;  %v891_v14 = vmul.f32 %v2690_v37, %v2386_v16 }
 0x7f8   :  { %958 = vrot.lane.b32.xlu0 %v898_v7, %s1732_s1  ;;  %964 = vrot.lane.b32.xlu1 %v901_v44, %s1732_s1  ;;  %v889_v39 = vmul.f32 %v2691_v57, %v2386_v16  ;;  %v887_v54 = vmul.f32 %v2695_v43, %v2386_v16  ;;  %v917_v32 = vmul.f32 %v2696_v8, %v2386_v16  ;;  %v2707_v44 = vunpack.i.h.bf16 %v2181_v24 }
 0x7f9   :  { %960 = vrot.lane.b32.xlu2 %v899_v6, %s1732_s1  ;;  %v913_v31 = vmul.f32 %v2697_v41, %v2386_v16  ;;  %v915_v19 = vmul.f32 %v2698_v11, %v2386_v16  ;;  %v911_v30 = vmul.f32 %v2702_v38, %v2386_v16  ;;  %v907_v60 = vmul.f32 %v2703_v28, %v2386_v16 }
 0x7fa   :  { %v1565_v0 = vpack.i.bf16 %v916_v52, %v917_v32  ;;  %v909_v56 = vmul.f32 %v2704_v45, %v2386_v16  ;;  %v906_v7 = vmul.f32 %v2706_v53, %v2380_v63  ;;  %v908_v6 = vmul.f32 %v2707_v44, %v2380_v63  ;;  %v791_v44 = vld [vmem:[#allocation5 + $0xd8] sm:$0xff] }
 0x7fb   :  { %v1575_v27 = vpack.i.bf16 %v912_v13, %v913_v31  ;;  %v1570_v26 = vpack.i.bf16 %v914_v36, %v915_v19  ;;  %v1580_v4 = vpack.i.bf16 %v910_v55, %v911_v30  ;;  %v903_v3 = vmul.f32 %v2709_v35, %v2386_v16 }
 0x7fc   :  { %v1585_v21 = vpack.i.bf16 %v908_v6, %v909_v56  ;;  %v2710_v24 = vunpack.i.h.bf16 %v2187_v5  ;;  %v2711_v15 = vunpack.i.h.bf16 %v2205_v42 }
 0x800   :  { %956 = vrot.lane.b32.xlu1 %v897_v34, %s1732_s1  ;;  %952 = vrot.lane.b32.xlu0 %v895_v33, %s1732_s1  ;;  %v1590_v34 = vpack.i.bf16 %v906_v7, %v907_v60  ;;  %v905_v33 = vmul.f32 %v2708_v9, %v2386_v16  ;;  %v792_v7 = vld [vmem:[#allocation5 + $0xe0] sm:$0xff] }
 0x801   :  { %954 = vrot.lane.b32.xlu2 %v896_v20, %s1732_s1  ;;  %v904_v20 = vmul.f32 %v2710_v24, %v2380_v63  ;;  %1163 = vmatpush.msrb.mxu1 %v792_v7 }
 0x803   :  { %v1595_v2 = vpack.i.bf16 %v904_v20, %v905_v33  ;;  %1164 = vmatpush.msrb.mxu1 %v791_v44 }
 0x808   :  { %950 = vrot.lane.b32.xlu1 %v894_v22, %s1732_s1  ;;  %946 = vrot.lane.b32.xlu0 %v892_v29, %s1732_s1  ;;  %v902_v22 = vmul.f32 %v2711_v15, %v2380_v63 }
 0x809   :  { %948 = vrot.lane.b32.xlu2 %v893_v48, %s1732_s1 }
 0x80a   :  { %v1600_v29 = vpack.i.bf16 %v902_v22, %v903_v3  ;;  %v789_v3 = vld [vmem:[#allocation5 + $0xc8] sm:$0xff] }
 0x810   :  { %944 = vrot.lane.b32.xlu1 %v891_v14, %s1732_s1  ;;  %940 = vrot.lane.b32.xlu0 %v889_v39, %s1732_s1 }
 0x811   :  { %942 = vrot.lane.b32.xlu2 %v890_v51, %s1732_s1 }
 0x818   :  { %938 = vrot.lane.b32.xlu1 %v888_v50, %s1732_s1  ;;  %934 = vrot.lane.b32.xlu0 %v886_v61, %s1732_s1 }
 0x819   :  { %936 = vrot.lane.b32.xlu2 %v887_v54, %s1732_s1 }
 0x820   :  { %1566 = vrot.lane.b32.xlu1 %v1565_v0, %s1733_s21  ;;  %1576 = vrot.lane.b32.xlu0 %v1575_v27, %s1733_s21 }
 0x821   :  { %1571 = vrot.lane.b32.xlu2 %v1570_v26, %s1733_s21 }
 0x828   :  { %1581 = vrot.lane.b32.xlu1 %v1580_v4, %s1733_s21  ;;  %1591 = vrot.lane.b32.xlu0 %v1590_v34, %s1733_s21 }
 0x829   :  { %1586 = vrot.lane.b32.xlu2 %v1585_v21, %s1733_s21 }
 0x830   :  { %1596 = vrot.lane.b32.xlu1 %v1595_v2, %s1733_s21 }
 0x831   :  { %1601 = vrot.lane.b32.xlu2 %v1600_v29, %s1733_s21 }
 0x853   :  { %v961_v49 = vpop.permute.xlu2 %960 }
 0x85b   :  { %v955_v57 = vpop.permute.xlu2 %954 }
 0x862   :  { %v963_v48 = vpop.permute.xlu0 %962 }
 0x863   :  { %v949_v42 = vpop.permute.xlu2 %948 }
 0x86a   :  { %v959_v37 = vpop.permute.xlu0 %958  ;;  %v965_v14 = vpop.permute.xlu1 %964 }
 0x86b   :  { %1393 = vmatpush.xpose.msk.msra.mxu0 %vm2712_vm2, %v965_v14  ;;  %v943_v46 = vpop.permute.xlu2 %942  ;;  %vm2727_vm2 = vmmov %vm2723_vm0 }
 0x86f   :  { %1394 = vmatpush.xpose.msk.msra.mxu0 %vm2713_vm3, %v963_v48  ;;  %vm2728_vm3 = vmmov %vm2723_vm0 }
 0x872   :  { %v957_v5 = vpop.permute.xlu1 %956  ;;  %v953_v39 = vpop.permute.xlu0 %952 }
 0x873   :  { %1395 = vmatpush.xpose.msk.msra.mxu0 %vm2714_vm4, %v961_v49  ;;  %v937_v61 = vpop.permute.xlu2 %936  ;;  %vm2729_vm4 = vmmov %vm2723_vm0  ;;  %v1176_v49 = vperm.slane %v2354_v1, 3 }
 0x877   :  { %1396 = vmatpush.xpose.msk.msra.mxu0 %vm2715_vm5, %v959_v37  ;;  %vm2730_vm5 = vmmov %vm2723_vm0 }
 0x87a   :  { %v951_v12 = vpop.permute.xlu1 %950  ;;  %v947_v51 = vpop.permute.xlu0 %946 }
 0x87b   :  { %1397 = vmatpush.xpose.msk.msra.mxu0 %vm2716_vm6, %v957_v5  ;;  %v1572_v41 = vpop.permute.xlu2 %1571  ;;  %vm2731_vm6 = vmmov %vm2723_vm0 }
 0x87c   :  { %v1573_v11 = vunpack.i.l.bf16 %v1572_v41  ;;  %v1574_v58 = vunpack.i.h.bf16 %v1572_v41  ;;  %v795_v41 = vld [vmem:[#allocation5 + $0xf8] sm:$0xff] }
 0x87f   :  { %1398 = vmatpush.xpose.msk.msra.mxu0 %vm2717_vm7, %v955_v57  ;;  %vm2732_vm7 = vmmov %vm2723_vm0 }
 0x882   :  { %v945_v50 = vpop.permute.xlu1 %944  ;;  %v941_v23 = vpop.permute.xlu0 %940 }
 0x883   :  { %1399 = vmatpush.xpose.msk.msra.mxu0 %vm2718_vm9, %v953_v39  ;;  %v1587_v36 = vpop.permute.xlu2 %1586  ;;  %vm2733_vm9 = vmmov %vm2723_vm0 }
 0x884   :  { %v1588_v27 = vunpack.i.l.bf16 %v1587_v36  ;;  %v1589_v38 = vunpack.i.h.bf16 %v1587_v36 }
 0x887   :  { %1400 = vmatpush.xpose.msk.msra.mxu0 %vm2719_vm10, %v951_v12  ;;  %vm2734_vm10 = vmmov %vm2723_vm0 }
 0x88a   :  { %v939_v43 = vpop.permute.xlu1 %938  ;;  %v935_v54 = vpop.permute.xlu0 %934 }
 0x88b   :  { %1401 = vmatpush.xpose.msk.msra.mxu0 %vm2720_vm13, %v949_v42  ;;  %v1602_v56 = vpop.permute.xlu2 %1601  ;;  %vm2735_vm13 = vmmov %vm2723_vm0 }
 0x88c   :  { %v1603_v55 = vunpack.i.l.bf16 %v1602_v56  ;;  %v1604_v53 = vunpack.i.h.bf16 %v1602_v56 }
 0x88f   :  { %1402 = vmatpush.xpose.msk.msra.mxu0 %vm2721_vm1, %v947_v51 }
 0x892   :  { %v1567_v8 = vpop.permute.xlu1 %1566  ;;  %v1577_v19 = vpop.permute.xlu0 %1576 }
 0x893   :  { %v1568_v32 = vunpack.i.l.bf16 %v1567_v8  ;;  %1403 = vmatpush.xpose.msk.msra.mxu0 %vm2722_vm12, %v945_v50  ;;  %v1569_v31 = vunpack.i.h.bf16 %v1567_v8  ;;  %v1578_v52 = vunpack.i.l.bf16 %v1577_v19  ;;  %v1579_v13 = vunpack.i.h.bf16 %v1577_v19 }
 0x895   :  { %1095 = vmatpush.msra.mxu2 %v1568_v32  ;;  %v796_v32 = vld [vmem:[#allocation5 + $0x100] sm:$0xff] }
 0x897   :  { %1404 = vmatpush.xpose.msk.msra.mxu0 %vm2723_vm0, %v943_v46  ;;  %1096 = vmatpush.msra.mxu2 %v1569_v31  ;;  %v794_v31 = vld [vmem:[#allocation5 + $0xf0] sm:$0xff] }
 0x899   :  { %1097 = vmatpush.msra.mxu2 %v1573_v11  ;;  %v793_v11 = vld [vmem:[#allocation5 + $0xe8] sm:$0xff] }
 0x89a   :  { %v1582_v17 = vpop.permute.xlu1 %1581  ;;  %v1592_v26 = vpop.permute.xlu0 %1591 }
 0x89b   :  { %1405 = vmatpush.xpose.msk.msra.mxu0 %vm2724_vm8, %v941_v23  ;;  %1098 = vmatpush.msra.mxu2 %v1574_v58  ;;  %v1583_v47 = vunpack.i.l.bf16 %v1582_v17  ;;  %v1584_v0 = vunpack.i.h.bf16 %v1582_v17  ;;  %v1593_v30 = vunpack.i.l.bf16 %v1592_v26  ;;  %v1594_v60 = vunpack.i.h.bf16 %v1592_v26 }
 0x89d   :  { %1099 = vmatpush.msra.mxu2 %v1578_v52 }
 0x89f   :  { %1406 = vmatpush.xpose.msk.msra.mxu0 %vm2725_vm11, %v939_v43  ;;  %1100 = vmatpush.msra.mxu2 %v1579_v13 }
 0x8a1   :  { %1101 = vmatpush.msra.mxu2 %v1583_v47 }
 0x8a2   :  { %v1597_v28 = vpop.permute.xlu1 %1596 }
 0x8a3   :  { %1407 = vmatpush.xpose.msk.msra.mxu0 %vm2726_vm14, %v937_v61  ;;  %1102 = vmatpush.msra.mxu2 %v1584_v0  ;;  %v1598_v45 = vunpack.i.l.bf16 %v1597_v28  ;;  %v1599_v40 = vunpack.i.h.bf16 %v1597_v28 }
 0x8a5   :  { %1103 = vmatpush.msra.mxu2 %v1588_v27 }
 0x8a7   :  { %1408 = vmatpush.xpose.msk.msra.mxu0 %vm2727_vm2, %v935_v54  ;;  %1104 = vmatpush.msra.mxu2 %v1589_v38 }
 0x8a9   :  { %1105 = vmatpush.msra.mxu2 %v1593_v30 }
 0x8aa   :  { %1409 = vmatmul.msk.f32.vlgmr.msra.gmra.mxu0 %vm2728_vm3, %v2380_v63  ;;  %vm2736_vm3 = vmmov %vm2727_vm2 }
 0x8ab   :  { %1106 = vmatpush.msra.mxu2 %v1594_v60 }
 0x8ad   :  { %1107 = vmatpush.msra.mxu2 %v1598_v45  ;;  %v1223_v45 = vperm.slane %v2354_v1, 4 }
 0x8af   :  { %1108 = vmatpush.msra.mxu2 %v1599_v40 }
 0x8b1   :  { %1109 = vmatpush.msra.mxu2 %v1603_v55 }
 0x8b2   :  { %1410 = vmatmul.msk.f32.gmra.mxu0 %vm2729_vm4, %v2386_v16  ;;  %v790_v16 = vld [vmem:[#allocation5 + $0xd0] sm:$0xff]  ;;  %vm2737_vm4 = vmmov %vm2727_vm2 }
 0x8b3   :  { %1110 = vmatpush.msra.mxu2 %v1604_v53  ;;  %1165 = vmatpush.msrb.mxu1 %v790_v16  ;;  %v802_v16 = vld [vmem:[#allocation5 + $0x130] sm:$0xff] }
 0x8b5   :  { %1166 = vmatpush.msrb.mxu1 %v789_v3  ;;  %v801_v3 = vld [vmem:[#allocation5 + $0x128] sm:$0xff] }
 0x8b7   :  { %1248 = vmatpush.msra.mxu1 %v796_v32 }
 0x8b9   :  { %1249 = vmatpush.msra.mxu1 %v795_v41 }
 0x8bb   :  { %1250 = vmatpush.msra.mxu1 %v794_v31  ;;  %v1308_v31 = vperm.slane %v2354_v1, 7 }
 0x8bd   :  { %1251 = vmatpush.msra.mxu1 %v793_v11 }
 0x927   :  { %v1021_v6 = vpop.f32.mrf.mxu0 }
 0x928   :  { %v1022_v63 = vadd.f32 %v1021_v6, %v2266_v25 }
 0x92a   :  { %v1027_v4 = vmul.f32 1.442695, %v1022_v63 }
 0x92c   :  { %1631 = vpow2.f32 %v1027_v4 }
 0x92f   :  { %v1024_v34 = vpop.f32.mrf.mxu0 }
 0x930   :  { %v1025_v21 = vadd.f32 %v1024_v34, %v2270_v62 }
 0x932   :  { %v1632_v9 = vpop.eup %1631  ;;  %v1029_v33 = vmul.f32 1.442695, %v1025_v21 }
 0x933   :  { %1111 = vmatmul.f32.vlgmr.msra.gmra.mxu2 %v1632_v9  ;;  %1134 = vmatmul.f32.vlgmr.msrb.gmra.mxu3 %v1632_v9 }
 0x934   :  { %1633 = vpow2.f32 %v1029_v33  ;;  %v804_v33 = vld [vmem:[#allocation5 + $0x140] sm:$0xff] }
 0x935   :  { %1291 = vmatpush.msrb.mxu2 %v804_v33 }
 0x93a   :  { %v1634_v35 = vpop.eup %1633 }
 0x93b   :  { %1114 = vmatmul.f32.gmra.mxu2 %v1634_v35  ;;  %1137 = vmatmul.f32.gmra.mxu3 %v1634_v35  ;;  %v803_v35 = vld [vmem:[#allocation5 + $0x138] sm:$0xff] }
 0x93c   :  { %1292 = vmatpush.msrb.mxu2 %v803_v35 }
 0x93e   :  { %1293 = vmatpush.msrb.mxu2 %v802_v16 }
 0x940   :  { %1294 = vmatpush.msrb.mxu2 %v801_v3 }
 0x9b6   :  { %v1135_v24 = vpop.f32.mrf.mxu3  ;;  %v1112_v25 = vpop.f32.mrf.mxu2 }
 0x9b7   :  { %1635 = vrcp.f32 %v1135_v24  ;;  %v800_v24 = vld [vmem:[#allocation5 + $0x120] sm:$0xff] }
 0x9b8   :  { %1295 = vmatpush.msrb.mxu2 %v800_v24 }
 0x9bd   :  { %v1636_v20 = vpop.eup %1635 }
 0x9be   :  { %v1138_v15 = vpop.f32.mrf.mxu3  ;;  %v1143_v22 = vmul.f32 %v1636_v20, %v1112_v25  ;;  %v1115_v2 = vpop.f32.mrf.mxu2  ;;  %v799_v25 = vld [vmem:[#allocation5 + $0x118] sm:$0xff]  ;;  %v798_v20 = vld [vmem:[#allocation5 + $0x110] sm:$0xff] }
 0x9bf   :  { %1637 = vrcp.f32 %v1138_v15  ;;  %1296 = vmatpush.msrb.mxu2 %v799_v25  ;;  %v797_v15 = vld [vmem:[#allocation5 + $0x108] sm:$0xff] }
 0x9c0   :  { %1427 = vmatmul.msk.f32.vlgmr.msrb.gmra.mxu1 %vm2730_vm5, %v1143_v22  ;;  %v1229_v22 = vperm.slane %v2354_v1, 6 }
 0x9c1   :  { %1297 = vmatpush.msrb.mxu2 %v798_v20 }
 0x9c3   :  { %1298 = vmatpush.msrb.mxu2 %v797_v15 }
 0x9c5   :  { %v1638_v62 = vpop.eup %1637 }
 0x9c6   :  { %v1144_v29 = vmul.f32 %v1638_v62, %v1115_v2 }
 0x9c8   :  { %1428 = vmatmul.msk.f32.gmra.mxu1 %vm2731_vm6, %v1144_v29 }
 0xa3d   :  { %v1168_v48 = vpop.f32.mrf.mxu1 }
 0xa3e   :  { %v1174_v37 = vadd.f32 %v1168_v48, %v2303_v59 }
 0xa40   :  { %v2530_v14 = vadd.f32 %v1176_v49, %v1174_v37 }
 0xa42   :  { %v1179_v57 = vsel %vm2732_vm7, %v2530_v14, 0.0 }
 0xa43   :  { %1180 = vadd.xlane.f32.xlu0 %v1179_v57 }
 0xa45   :  { %v1171_v5 = vpop.f32.mrf.mxu1 }
 0xa46   :  { %v1175_v39 = vadd.f32 %v1171_v5, %v2308_v18 }
 0xa48   :  { %v2535_v42 = vadd.f32 %v1176_v49, %v1175_v39 }
 0xa4a   :  { %v1182_v12 = vsel %vm2733_vm9, %v2535_v42, 0.0 }
 0xa4b   :  { %1183 = vadd.xlane.f32.xlu1 %v1182_v12 }
 0xab6   :  { %v1181_v51 = vpop.xlane.xlu0 %1180 }
 0xab7   :  { %v1185_v46 = vmul.f32 %v1181_v51, %v1772_v10 }
 0xab9   :  { %v1187_v59 = vsub.f32 %v2530_v14, %v1185_v46 }
 0xabb   :  { %v1189_v50 = vmul.f32 %v1187_v59, %v1187_v59 }
 0xabd   :  { %v1191_v23 = vsel %vm2734_vm10, %v1189_v50, 0.0 }
 0xabe   :  { %1192 = vadd.xlane.f32.xlu2 %v1191_v23  ;;  %v1184_v61 = vpop.xlane.xlu1 %1183 }
 0xabf   :  { %v1186_v43 = vmul.f32 %v1184_v61, %v1772_v10 }
 0xac1   :  { %v1188_v18 = vsub.f32 %v2535_v42, %v1186_v43 }
 0xac3   :  { %v1190_v54 = vmul.f32 %v1188_v18, %v1188_v18 }
 0xac5   :  { %v1194_v8 = vsel %vm2735_vm13, %v1190_v54, 0.0 }
 0xac6   :  { %1195 = vadd.xlane.f32.xlu0 %v1194_v8 }
 0xb31   :  { %v1193_v19 = vpop.xlane.xlu2 %1192 }
 0xb32   :  { %v1197_v58 = vmul.f32 %v1193_v19, %v1772_v10 }
 0xb34   :  { %v1199_v52 = vadd.f32 1e-05, %v1197_v58 }
 0xb36   :  { %1639 = vrsqrt.f32 %v1199_v52  ;;  %vm1207_vm12 = vweird.f32 %v1199_v52 }
 0xb39   :  { %v1196_v17 = vpop.xlane.xlu0 %1195 }
 0xb3a   :  { %v1198_v13 = vmul.f32 %v1196_v17, %v1772_v10  ;;  %v1226_v10 = vperm.slane %v2354_v1, 5 }
 0xb3c   :  { %v1640_v47 = vpop.eup %1639  ;;  %v1200_v36 = vadd.f32 1e-05, %v1198_v13 }
 0xb3d   :  { %v1202_v0 = vmul.f32 %v1640_v47, %v1199_v52  ;;  %vm1208_vm1 = vweird.f32 %v1640_v47 }
 0xb3e   :  { %1641 = vrsqrt.f32 %v1200_v36  ;;  %vm1209_vm0 = vmor %vm1207_vm12, %vm1208_vm1  ;;  %vm1217_vm11 = vweird.f32 %v1200_v36 }
 0xb3f   :  { %v1203_v27 = vmul.f32 %v1640_v47, %v1202_v0 }
 0xb41   :  { %v1204_v26 = vmul.f32 0.5, %v1203_v27 }
 0xb43   :  { %v1205_v38 = vsub.f32 1.5, %v1204_v26 }
 0xb44   :  { %v1642_v30 = vpop.eup %1641 }
 0xb45   :  { %v1206_v28 = vmul.f32 %v1640_v47, %v1205_v38  ;;  %v1212_v60 = vmul.f32 %v1642_v30, %v1200_v36  ;;  %vm1218_vm8 = vweird.f32 %v1642_v30 }
 0xb46   :  { %vm1219_vm14 = vmor %vm1217_vm11, %vm1218_vm8 }
 0xb47   :  { %v1210_v56 = vsel %vm1209_vm0, %v1640_v47, %v1206_v28  ;;  %v1213_v40 = vmul.f32 %v1642_v30, %v1212_v60 }
 0xb48   :  { %v1221_v55 = vmul.f32 %v1210_v56, %v1187_v59 }
 0xb49   :  { %v1214_v53 = vmul.f32 0.5, %v1213_v40 }
 0xb4a   :  { %v1224_v7 = vmul.f32 %v1223_v45, %v1221_v55 }
 0xb4b   :  { %v1215_v44 = vsub.f32 1.5, %v1214_v53 }
 0xb4c   :  { %v1227_v6 = vadd.f32 %v1226_v10, %v1224_v7 }
 0xb4d   :  { %v1216_v63 = vmul.f32 %v1642_v30, %v1215_v44 }
 0xb4e   :  { %1429 = vmatmul.msk.f32.vlgmr.msra.gmra.mxu1 %vm2727_vm2, %v1227_v6 }
 0xb4f   :  { %v1220_v4 = vsel %vm1219_vm14, %v1642_v30, %v1216_v63 }
 0xb50   :  { %v1222_v34 = vmul.f32 %v1220_v4, %v1188_v18 }
 0xb52   :  { %v1225_v21 = vmul.f32 %v1223_v45, %v1222_v34 }
 0xb54   :  { %v1228_v9 = vadd.f32 %v1226_v10, %v1225_v21 }
 0xb56   :  { %1430 = vmatmul.msk.f32.gmra.mxu1 %vm2736_vm3, %v1228_v9 }
 0xbcb   :  { %v1253_v62 = vpop.f32.mrf.mxu1 }
 0xbcc   :  { %v1254_v2 = vadd.f32 %v1253_v62, %v1229_v22 }
 0xbce   :  { %v1259_v29 = vmul.f32 %v1254_v2, %v1254_v2 }
 0xbd0   :  { %v1261_v49 = vmul.f32 %v1259_v29, %v1254_v2 }
 0xbd2   :  { %v1263_v48 = vmul.f32 0.044715, %v1261_v49 }
 0xbd3   :  { %v1256_v37 = vpop.f32.mrf.mxu1 }
 0xbd4   :  { %v1265_v57 = vadd.f32 %v1263_v48, %v1254_v2  ;;  %v1257_v5 = vadd.f32 %v1256_v37, %v1229_v22 }
 0xbd6   :  { %v1267_v39 = vmul.f32 0.7978846, %v1265_v57  ;;  %v1260_v12 = vmul.f32 %v1257_v5, %v1257_v5 }
 0xbd8   :  { %1643 = vtanh.f32 %v1267_v39  ;;  %v1262_v51 = vmul.f32 %v1260_v12, %v1257_v5 }
 0xbda   :  { %v1264_v46 = vmul.f32 0.044715, %v1262_v51 }
 0xbdc   :  { %v1266_v59 = vadd.f32 %v1264_v46, %v1257_v5 }
 0xbde   :  { %v1644_v50 = vpop.eup %1643  ;;  %v1268_v23 = vmul.f32 0.7978846, %v1266_v59 }
 0xbdf   :  { %v1271_v61 = vadd.f32 1.0, %v1644_v50 }
 0xbe0   :  { %1645 = vtanh.f32 %v1268_v23 }
 0xbe1   :  { %v1273_v43 = vmul.f32 0.5, %v1271_v61 }
 0xbe3   :  { %v1275_v18 = vmul.f32 %v1273_v43, %v1254_v2 }
 0xbe5   :  { %1431 = vmatmul.msk.f32.vlgmr.msrb.gmra.mxu2 %vm750_vm15, %v1275_v18 }
 0xbe6   :  { %v1646_v54 = vpop.eup %1645 }
 0xbe7   :  { %v1272_v8 = vadd.f32 1.0, %v1646_v54 }
 0xbe9   :  { %v1274_v32 = vmul.f32 0.5, %v1272_v8 }
 0xbeb   :  { %v1276_v41 = vmul.f32 %v1274_v32, %v1257_v5 }
 0xbed   :  { %1432 = vmatmul.msk.f32.gmra.mxu2 %vm750_vm15, %v1276_v41  ;;  %vm2738_vm15 = vmmov %vm2727_vm2 }
 0xc68   :  { %v1300_v11 = vpop.f32.mrf.mxu2 }
 0xc69   :  { %v1306_v19 = vadd.f32 %v1300_v11, %v2530_v14 }
 0xc6b   :  { %v1309_v58 = vadd.f32 %v1308_v31, %v1306_v19 }
 0xc6d   :  { %1311 = vst.msk [vmem:[#allocation7] sm:$0xff] %vm2737_vm4, %v1309_v58 }
 0xc70   :  { %v1303_v52 = vpop.f32.mrf.mxu2 }
 0xc71   :  { %v1307_v17 = vadd.f32 %v1303_v52, %v2535_v42 }
 0xc73   :  { %v1310_v13 = vadd.f32 %v1308_v31, %v1307_v17 }
 0xc75   :  { %1312 = vst.msk [vmem:[#allocation7 + $0x8] sm:$0xff] %vm2738_vm15, %v1310_v13 }
 0xc76   :  { %1325 = dma.vmem_to_hbm [thread:$0]  %s1318_s23, 256, %s1320_s26, [#allocation4], %s1726_s17, %s1726_s17, %s1727_s18  }
 0xc77   :  { %1723 = dma.done.wait [#allocation4], 256  }
 0xc78   :  { %1724 = vsyncadd [#allocation4], 4294967040 }
 0xc79   :  { %1330 = vsyncpa [#allocation3], 1 }
 0xc7a   :  { %1331 = vsyncpa [#allocation6], 1 }
 0xc7b   :  { %1332 = vsyncpa [#allocation4], 1 }

</bundles_post_ra>
